<compile_context>
chip_gen: v6e
topology: v6e:2x2x1
jax: 0.10.0
libtpu: 0.0.40
codegen_flags: <defaults>
</compile_context>

<pallas_src>
import functools

import jax
import jax.numpy as jnp
from jax import lax
from jax.experimental import pallas as pl
from jax.experimental.pallas import tpu as pltpu


def denoise_kernel(H, W, x_ref, w1t_ref, b1_ref, w2t_ref, b2_ref, vmask_ref,
                   o_ref, mid_ref):
    """One batch element per grid step.

    x_ref    : (1, Cin_p, xcols)  bf16  zero-padded input, spatial flattened
                                        as Hp*Wp on the lane axis
    w1t_ref  : (Cmid, 9*Cin_p)    bf16  conv1 weights (BN folded), im2col^T
    b1_ref   : (Cmid, 1)          f32   conv1 bias (BN folded)
    w2t_ref  : (Cout, 9*Cmid)     bf16  conv2 weights (BN folded), im2col^T
    b2_ref   : (Cout, 1)          f32   conv2 bias (BN folded)
    vmask_ref: (1, M)             f32   1.0 on valid extended cols, 0.0 junk
    o_ref    : (1, Cout, H*W)     f32   dense NC(HW) output (lane-dense)
    mid_ref  : VMEM (Cmid, xcols) bf16  zero-padded conv1 activation
    """
    Hp, Wp = H + 2, W + 2
    M = H * Wp                        # extended conv width (2 junk cols/row)
    Cmid = w1t_ref.shape[0]
    xcols = mid_ref.shape[1]

    x = x_ref[0]                                          # (Cin_p, xcols) bf16

    # ---- conv1: 9 taps as lane-shifted slices -> one (Cmid,72)x(72,M) dot --
    taps1 = [x[:, dy * Wp + dx: dy * Wp + dx + M]
             for dy in range(3) for dx in range(3)]
    patches1 = jnp.concatenate(taps1, axis=0)             # (9*Cin_p, M) bf16
    y1 = jnp.dot(w1t_ref[...], patches1,
                 preferred_element_type=jnp.float32)      # (Cmid, M) f32
    # folded-BN bias + ReLU, then zero the junk columns (they become the
    # left/right zero padding of the staged intermediate).
    h1 = jnp.maximum(y1 + b1_ref[...], 0.0) * vmask_ref[...]

    # ---- stage padded intermediate in VMEM (only border cols re-zeroed) ----
    mid_ref[:, 0:Wp + 1] = jnp.zeros((Cmid, Wp + 1), mid_ref.dtype)
    tail = xcols - (Wp + 1 + M)
    mid_ref[:, Wp + 1 + M:xcols] = jnp.zeros((Cmid, tail), mid_ref.dtype)
    mid_ref[:, Wp + 1:Wp + 1 + M] = h1.astype(mid_ref.dtype)

    # ---- conv2: same trick, K = 9*Cmid = 576 ----
    m = mid_ref[...]                                      # (Cmid, xcols) bf16
    taps2 = [m[:, dy * Wp + dx: dy * Wp + dx + M]
             for dy in range(3) for dx in range(3)]
    patches2 = jnp.concatenate(taps2, axis=0)             # (9*Cmid, M) bf16
    y2 = jnp.dot(w2t_ref[...], patches2,
                 preferred_element_type=jnp.float32)      # (Cout, M) f32

    # ---- compact extended (h*Wp + w) cols -> dense (h*W + w) cols ----------
    # Drops the 2 junk cols per image row inside the kernel so the output
    # store is a lane-dense multiple of 128 and the wrapper is reshape-only.
    y2d = jnp.concatenate([y2[:, h * Wp: h * Wp + W] for h in range(H)],
                          axis=1)                         # (Cout, H*W) f32
    o_ref[0] = jnp.maximum(y2d + b2_ref[...], 0.0).astype(o_ref.dtype)


def denoise_forward(x_nchw, w1, b1, w2, b2):
    """x_nchw: (N, Cin, H, W) f32.  w1/w2: HWIO (BN-folded), b1/b2: (C,)."""
    N, Cin, H, W = x_nchw.shape
    Hp, Wp = H + 2, W + 2
    M = H * Wp
    xcols = M + 2 * Wp + 2           # = Hp*Wp + 2: room for the largest tap
    Cmid, Cout = w1.shape[3], w2.shape[3]
    Cin_p = max(8, ((Cin + 7) // 8) * 8)     # pad channels to sublane multiple

    # Input stays channel-major (native NCHW): channels -> sublanes,
    # flattened zero-padded spatial -> lanes.  No NHWC transpose needed.
    xp = jnp.pad(x_nchw, ((0, 0), (0, Cin_p - Cin), (1, 1), (1, 1)))
    xp = xp.reshape(N, Cin_p, Hp * Wp)
    xp = jnp.pad(xp, ((0, 0), (0, 0), (0, xcols - Hp * Wp)))
    xp = xp.astype(jnp.bfloat16)

    # Weights -> transposed im2col layout, bf16 (f32 accumulation in-kernel).
    w1p = jnp.pad(w1, ((0, 0), (0, 0), (0, Cin_p - Cin), (0, 0)))
    w1t = w1p.reshape(9 * Cin_p, Cmid).T.astype(jnp.bfloat16)   # (Cmid, 9*Cin_p)
    w2t = w2.reshape(9 * Cmid, Cout).T.astype(jnp.bfloat16)     # (Cout, 9*Cmid)
    b1c = b1.reshape(Cmid, 1).astype(jnp.float32)
    b2c = b2.reshape(Cout, 1).astype(jnp.float32)

    # Valid-column mask: extended column r = h*Wp + w is junk for w >= W.
    vmask = (jnp.arange(M) % Wp < W).astype(jnp.float32)[None, :]   # (1, M)

    kernel = functools.partial(denoise_kernel, H, W)
    out = pl.pallas_call(
        kernel,
        out_shape=jax.ShapeDtypeStruct((N, Cout, H * W), jnp.float32),
        grid_spec=pltpu.PrefetchScalarGridSpec(
            num_scalar_prefetch=0,
            grid=(N,),
            in_specs=[
                pl.BlockSpec((1, Cin_p, xcols), lambda n: (n, 0, 0)),
                pl.BlockSpec((Cmid, 9 * Cin_p), lambda n: (0, 0)),
                pl.BlockSpec((Cmid, 1), lambda n: (0, 0)),
                pl.BlockSpec((Cout, 9 * Cmid), lambda n: (0, 0)),
                pl.BlockSpec((Cout, 1), lambda n: (0, 0)),
                pl.BlockSpec((1, M), lambda n: (0, 0)),
            ],
            out_specs=pl.BlockSpec((1, Cout, H * W), lambda n: (n, 0, 0)),
            scratch_shapes=[pltpu.VMEM((Cmid, xcols), jnp.bfloat16)],
        ),
        compiler_params=pltpu.CompilerParams(
            dimension_semantics=("parallel",),
            vmem_limit_bytes=32 * 1024 * 1024),
    )(xp, w1t, b1c, w2t, b2c, vmask)

    # Output is already dense NC(H*W); reshape is metadata-only.
    return out.reshape(N, Cout, H, W)


def _fold_bn(w_hwio, b, gamma, beta, mean, var, eps=1e-5):
    """Fold eval-mode BatchNorm into a conv (HWIO weights, per-Cout stats)."""
    scale = gamma / jnp.sqrt(var + eps)                           # (Cout,)
    w_f = w_hwio * scale[None, None, None, :]
    b_f = (b - mean) * scale + beta
    return w_f.astype(jnp.float32), b_f.astype(jnp.float32)


def _reference(x_nchw, w1, b1, w2, b2):
    """Pure-JAX reference matching the kernel numerics (bf16 operands,
    f32 accumulation, bf16-staged intermediate)."""
    q = lambda a: a.astype(jnp.bfloat16).astype(jnp.float32)
    dn = lax.conv_dimension_numbers(x_nchw.shape, (3, 3, 1, 1),
                                    ("NCHW", "HWIO", "NCHW"))

    def conv(x, w, b):
        y = lax.conv_general_dilated(q(x), q(w), window_strides=(1, 1),
                                     padding="SAME", dimension_numbers=dn,
                                     precision=lax.Precision.HIGHEST)
        return jnp.maximum(y + b[None, :, None, None], 0.0)

    h = conv(x_nchw, w1, b1)
    h = q(h)                       # kernel stages the intermediate in bf16
    return conv(h, w2, b2)


if __name__ == "__main__":
    key = jax.random.PRNGKey(0)
    N, Cin, H, W = 2, 4, 16, 16
    Cmid = Cout = 64

    ks = jax.random.split(key, 12)
    x = jax.random.normal(ks[0], (N, Cin, H, W), jnp.float32)

    # conv1 + BN1 parameters (deterministic synthetic init)
    w1 = jax.random.normal(ks[1], (3, 3, Cin, Cmid), jnp.float32) * 0.1
    b1 = jax.random.normal(ks[2], (Cmid,), jnp.float32) * 0.05
    g1 = 1.0 + 0.1 * jax.random.normal(ks[3], (Cmid,), jnp.float32)
    be1 = 0.05 * jax.random.normal(ks[4], (Cmid,), jnp.float32)
    mu1 = 0.05 * jax.random.normal(ks[5], (Cmid,), jnp.float32)
    var1 = 1.0 + 0.1 * jax.nn.softplus(jax.random.normal(ks[6], (Cmid,)))

    # conv2 + BN2 parameters
    w2 = jax.random.normal(ks[7], (3, 3, Cmid, Cout), jnp.float32) * 0.05
    b2 = jax.random.normal(ks[8], (Cout,), jnp.float32) * 0.05
    g2 = 1.0 + 0.1 * jax.random.normal(ks[9], (Cout,), jnp.float32)
    be2 = 0.05 * jax.random.normal(ks[10], (Cout,), jnp.float32)
    mu2 = 0.05 * jax.random.normal(ks[11], (Cout,), jnp.float32)
    var2 = 1.0 + 0.1 * jax.nn.softplus(jax.random.normal(key, (Cout,)))

    # Fold eval-mode BatchNorm into the convolutions (plain-JAX glue).
    w1f, b1f = _fold_bn(w1, b1, g1, be1, mu1, var1)
    w2f, b2f = _fold_bn(w2, b2, g2, be2, mu2, var2)

    out = denoise_forward(x, w1f, b1f, w2f, b2f)
    out = jax.block_until_ready(out)

    ref = _reference(x, w1f, b1f, w2f, b2f)
    assert out.shape == (N, Cout, H, W)
    err = float(jnp.max(jnp.abs(out - ref)))
    assert jnp.allclose(out, ref, atol=1e-2, rtol=1e-2), err

    print("KERNEL_OK")
</pallas_src>

<mosaic_0001>
module attributes {stable_mosaic.version = 11 : i64} {
  func.func @denoise_kernel(%arg0: i32, %arg1: memref<1x8x326xbf16, #tpu.memory_space<vmem>>, %arg2: memref<64x72xbf16, #tpu.memory_space<vmem>>, %arg3: memref<64x1xf32, #tpu.memory_space<vmem>>, %arg4: memref<64x576xbf16, #tpu.memory_space<vmem>>, %arg5: memref<64x1xf32, #tpu.memory_space<vmem>>, %arg6: memref<1x288xf32, #tpu.memory_space<vmem>>, %arg7: memref<1x64x256xf32, #tpu.memory_space<vmem>>, %arg8: memref<64x326xbf16, #tpu.memory_space<vmem>>) attributes {dimension_semantics = [#tpu.dimension_semantics<parallel>], iteration_bounds = array<i64: 2>, scalar_prefetch = 0 : i64, scratch_operands = 1 : i64, tpu.core_type = #tpu.core_type<tc>, window_params = [{transform_indices = @transform_0, window_bounds = array<i64: 1, 8, 326>}, {pipeline_mode = #tpu.pipeline_mode<synchronous>, transform_indices = @transform_1, window_bounds = array<i64: 64, 72>}, {pipeline_mode = #tpu.pipeline_mode<synchronous>, transform_indices = @transform_2, window_bounds = array<i64: 64, 1>}, {pipeline_mode = #tpu.pipeline_mode<synchronous>, transform_indices = @transform_3, window_bounds = array<i64: 64, 576>}, {pipeline_mode = #tpu.pipeline_mode<synchronous>, transform_indices = @transform_4, window_bounds = array<i64: 64, 1>}, {pipeline_mode = #tpu.pipeline_mode<synchronous>, transform_indices = @transform_5, window_bounds = array<i64: 1, 288>}, {transform_indices = @transform_6, window_bounds = array<i64: 1, 64, 256>}]} {
    %c0 = arith.constant 0 : index
    %c0_0 = arith.constant 0 : index
    %c0_1 = arith.constant 0 : index
    %0 = vector.load %arg1[%c0, %c0_0, %c0_1] : memref<1x8x326xbf16, #tpu.memory_space<vmem>>, vector<1x8x326xbf16>
    %1 = vector.shape_cast %0 : vector<1x8x326xbf16> to vector<8x326xbf16>
    %2 = vector.extract_strided_slice %1 {offsets = [0, 0], sizes = [8, 288], strides = [1, 1]} : vector<8x326xbf16> to vector<8x288xbf16>
    %3 = vector.extract_strided_slice %1 {offsets = [0, 1], sizes = [8, 288], strides = [1, 1]} : vector<8x326xbf16> to vector<8x288xbf16>
    %4 = vector.extract_strided_slice %1 {offsets = [0, 2], sizes = [8, 288], strides = [1, 1]} : vector<8x326xbf16> to vector<8x288xbf16>
    %5 = vector.extract_strided_slice %1 {offsets = [0, 18], sizes = [8, 288], strides = [1, 1]} : vector<8x326xbf16> to vector<8x288xbf16>
    %6 = vector.extract_strided_slice %1 {offsets = [0, 19], sizes = [8, 288], strides = [1, 1]} : vector<8x326xbf16> to vector<8x288xbf16>
    %7 = vector.extract_strided_slice %1 {offsets = [0, 20], sizes = [8, 288], strides = [1, 1]} : vector<8x326xbf16> to vector<8x288xbf16>
    %8 = vector.extract_strided_slice %1 {offsets = [0, 36], sizes = [8, 288], strides = [1, 1]} : vector<8x326xbf16> to vector<8x288xbf16>
    %9 = vector.extract_strided_slice %1 {offsets = [0, 37], sizes = [8, 288], strides = [1, 1]} : vector<8x326xbf16> to vector<8x288xbf16>
    %10 = vector.extract_strided_slice %1 {offsets = [0, 38], sizes = [8, 288], strides = [1, 1]} : vector<8x326xbf16> to vector<8x288xbf16>
    %11 = tpu.concatenate %2, %3, %4, %5, %6, %7, %8, %9, %10 in 0 : vector<8x288xbf16>, vector<8x288xbf16>, vector<8x288xbf16>, vector<8x288xbf16>, vector<8x288xbf16>, vector<8x288xbf16>, vector<8x288xbf16>, vector<8x288xbf16>, vector<8x288xbf16> -> vector<72x288xbf16>
    %c0_2 = arith.constant 0 : index
    %c0_3 = arith.constant 0 : index
    %12 = vector.load %arg2[%c0_2, %c0_3] : memref<64x72xbf16, #tpu.memory_space<vmem>>, vector<64x72xbf16>
    %cst = arith.constant dense<0.000000e+00> : vector<64x288xf32>
    %13 = tpu.matmul %12, %11, %cst {dimension_numbers = #tpu.dot_dimension_numbers<[1], [0], [0], [1], [0, 0, 1, 1], [], []>} : vector<64x72xbf16>, vector<72x288xbf16>, vector<64x288xf32> -> vector<64x288xf32>
    %c0_4 = arith.constant 0 : index
    %c0_5 = arith.constant 0 : index
    %14 = vector.load %arg3[%c0_4, %c0_5] : memref<64x1xf32, #tpu.memory_space<vmem>>, vector<64x1xf32>
    %15 = vector.broadcast %14 : vector<64x1xf32> to vector<64x288xf32>
    %16 = arith.addf %13, %15 : vector<64x288xf32>
    %cst_6 = arith.constant 0.000000e+00 : f32
    %17 = vector.broadcast %cst_6 : f32 to vector<64x288xf32>
    %18 = arith.maximumf %16, %17 : vector<64x288xf32>
    %c0_7 = arith.constant 0 : index
    %c0_8 = arith.constant 0 : index
    %19 = vector.load %arg6[%c0_7, %c0_8] : memref<1x288xf32, #tpu.memory_space<vmem>>, vector<1x288xf32>
    %20 = vector.broadcast %19 : vector<1x288xf32> to vector<64x288xf32>
    %21 = arith.mulf %18, %20 : vector<64x288xf32>
    %cst_9 = arith.constant 0.000000e+00 : bf16
    %22 = vector.broadcast %cst_9 : bf16 to vector<64x19xbf16>
    %c0_10 = arith.constant 0 : index
    %c0_11 = arith.constant 0 : index
    %23 = vector.load %arg8[%c0_10, %c0_11] : memref<64x326xbf16, #tpu.memory_space<vmem>>, vector<64x19xbf16>
    tpu.vector_store %arg8[%c0_10, %c0_11], %22 {strides = array<i32>} : memref<64x326xbf16, #tpu.memory_space<vmem>>, vector<64x19xbf16>,
    %cst_12 = arith.constant 0.000000e+00 : bf16
    %24 = vector.broadcast %cst_12 : bf16 to vector<64x19xbf16>
    %c0_13 = arith.constant 0 : index
    %c307 = arith.constant 307 : index
    %25 = vector.load %arg8[%c0_13, %c307] : memref<64x326xbf16, #tpu.memory_space<vmem>>, vector<64x19xbf16>
    tpu.vector_store %arg8[%c0_13, %c307], %24 {strides = array<i32>} : memref<64x326xbf16, #tpu.memory_space<vmem>>, vector<64x19xbf16>,
    %26 = arith.truncf %21 : vector<64x288xf32> to vector<64x288xbf16>
    %c0_14 = arith.constant 0 : index
    %c19 = arith.constant 19 : index
    %27 = vector.load %arg8[%c0_14, %c19] : memref<64x326xbf16, #tpu.memory_space<vmem>>, vector<64x288xbf16>
    tpu.vector_store %arg8[%c0_14, %c19], %26 {strides = array<i32>} : memref<64x326xbf16, #tpu.memory_space<vmem>>, vector<64x288xbf16>,
    %c0_15 = arith.constant 0 : index
    %c0_16 = arith.constant 0 : index
    %28 = vector.load %arg8[%c0_15, %c0_16] : memref<64x326xbf16, #tpu.memory_space<vmem>>, vector<64x326xbf16>
    %29 = vector.extract_strided_slice %28 {offsets = [0, 0], sizes = [64, 288], strides = [1, 1]} : vector<64x326xbf16> to vector<64x288xbf16>
    %30 = vector.extract_strided_slice %28 {offsets = [0, 1], sizes = [64, 288], strides = [1, 1]} : vector<64x326xbf16> to vector<64x288xbf16>
    %31 = vector.extract_strided_slice %28 {offsets = [0, 2], sizes = [64, 288], strides = [1, 1]} : vector<64x326xbf16> to vector<64x288xbf16>
    %32 = vector.extract_strided_slice %28 {offsets = [0, 18], sizes = [64, 288], strides = [1, 1]} : vector<64x326xbf16> to vector<64x288xbf16>
    %33 = vector.extract_strided_slice %28 {offsets = [0, 19], sizes = [64, 288], strides = [1, 1]} : vector<64x326xbf16> to vector<64x288xbf16>
    %34 = vector.extract_strided_slice %28 {offsets = [0, 20], sizes = [64, 288], strides = [1, 1]} : vector<64x326xbf16> to vector<64x288xbf16>
    %35 = vector.extract_strided_slice %28 {offsets = [0, 36], sizes = [64, 288], strides = [1, 1]} : vector<64x326xbf16> to vector<64x288xbf16>
    %36 = vector.extract_strided_slice %28 {offsets = [0, 37], sizes = [64, 288], strides = [1, 1]} : vector<64x326xbf16> to vector<64x288xbf16>
    %37 = vector.extract_strided_slice %28 {offsets = [0, 38], sizes = [64, 288], strides = [1, 1]} : vector<64x326xbf16> to vector<64x288xbf16>
    %38 = tpu.concatenate %29, %30, %31, %32, %33, %34, %35, %36, %37 in 0 : vector<64x288xbf16>, vector<64x288xbf16>, vector<64x288xbf16>, vector<64x288xbf16>, vector<64x288xbf16>, vector<64x288xbf16>, vector<64x288xbf16>, vector<64x288xbf16>, vector<64x288xbf16> -> vector<576x288xbf16>
    %c0_17 = arith.constant 0 : index
    %c0_18 = arith.constant 0 : index
    %39 = vector.load %arg4[%c0_17, %c0_18] : memref<64x576xbf16, #tpu.memory_space<vmem>>, vector<64x576xbf16>
    %cst_19 = arith.constant dense<0.000000e+00> : vector<64x288xf32>
    %40 = tpu.matmul %39, %38, %cst_19 {dimension_numbers = #tpu.dot_dimension_numbers<[1], [0], [0], [1], [0, 0, 1, 1], [], []>} : vector<64x576xbf16>, vector<576x288xbf16>, vector<64x288xf32> -> vector<64x288xf32>
    %41 = vector.extract_strided_slice %40 {offsets = [0, 0], sizes = [64, 16], strides = [1, 1]} : vector<64x288xf32> to vector<64x16xf32>
    %42 = vector.extract_strided_slice %40 {offsets = [0, 18], sizes = [64, 16], strides = [1, 1]} : vector<64x288xf32> to vector<64x16xf32>
    %43 = vector.extract_strided_slice %40 {offsets = [0, 36], sizes = [64, 16], strides = [1, 1]} : vector<64x288xf32> to vector<64x16xf32>
    %44 = vector.extract_strided_slice %40 {offsets = [0, 54], sizes = [64, 16], strides = [1, 1]} : vector<64x288xf32> to vector<64x16xf32>
    %45 = vector.extract_strided_slice %40 {offsets = [0, 72], sizes = [64, 16], strides = [1, 1]} : vector<64x288xf32> to vector<64x16xf32>
    %46 = vector.extract_strided_slice %40 {offsets = [0, 90], sizes = [64, 16], strides = [1, 1]} : vector<64x288xf32> to vector<64x16xf32>
    %47 = vector.extract_strided_slice %40 {offsets = [0, 108], sizes = [64, 16], strides = [1, 1]} : vector<64x288xf32> to vector<64x16xf32>
    %48 = vector.extract_strided_slice %40 {offsets = [0, 126], sizes = [64, 16], strides = [1, 1]} : vector<64x288xf32> to vector<64x16xf32>
    %49 = vector.extract_strided_slice %40 {offsets = [0, 144], sizes = [64, 16], strides = [1, 1]} : vector<64x288xf32> to vector<64x16xf32>
    %50 = vector.extract_strided_slice %40 {offsets = [0, 162], sizes = [64, 16], strides = [1, 1]} : vector<64x288xf32> to vector<64x16xf32>
    %51 = vector.extract_strided_slice %40 {offsets = [0, 180], sizes = [64, 16], strides = [1, 1]} : vector<64x288xf32> to vector<64x16xf32>
    %52 = vector.extract_strided_slice %40 {offsets = [0, 198], sizes = [64, 16], strides = [1, 1]} : vector<64x288xf32> to vector<64x16xf32>
    %53 = vector.extract_strided_slice %40 {offsets = [0, 216], sizes = [64, 16], strides = [1, 1]} : vector<64x288xf32> to vector<64x16xf32>
    %54 = vector.extract_strided_slice %40 {offsets = [0, 234], sizes = [64, 16], strides = [1, 1]} : vector<64x288xf32> to vector<64x16xf32>
    %55 = vector.extract_strided_slice %40 {offsets = [0, 252], sizes = [64, 16], strides = [1, 1]} : vector<64x288xf32> to vector<64x16xf32>
    %56 = vector.extract_strided_slice %40 {offsets = [0, 270], sizes = [64, 16], strides = [1, 1]} : vector<64x288xf32> to vector<64x16xf32>
    %57 = tpu.concatenate %41, %42, %43, %44, %45, %46, %47, %48, %49, %50, %51, %52, %53, %54, %55, %56 in 1 : vector<64x16xf32>, vector<64x16xf32>, vector<64x16xf32>, vector<64x16xf32>, vector<64x16xf32>, vector<64x16xf32>, vector<64x16xf32>, vector<64x16xf32>, vector<64x16xf32>, vector<64x16xf32>, vector<64x16xf32>, vector<64x16xf32>, vector<64x16xf32>, vector<64x16xf32>, vector<64x16xf32>, vector<64x16xf32> -> vector<64x256xf32>
    %c0_20 = arith.constant 0 : index
    %c0_21 = arith.constant 0 : index
    %58 = vector.load %arg5[%c0_20, %c0_21] : memref<64x1xf32, #tpu.memory_space<vmem>>, vector<64x1xf32>
    %59 = vector.broadcast %58 : vector<64x1xf32> to vector<64x256xf32>
    %60 = arith.addf %57, %59 : vector<64x256xf32>
    %cst_22 = arith.constant 0.000000e+00 : f32
    %61 = vector.broadcast %cst_22 : f32 to vector<64x256xf32>
    %62 = arith.maximumf %60, %61 : vector<64x256xf32>
    %c0_23 = arith.constant 0 : index
    %c0_24 = arith.constant 0 : index
    %c0_25 = arith.constant 0 : index
    %63 = vector.load %arg7[%c0_23, %c0_24, %c0_25] : memref<1x64x256xf32, #tpu.memory_space<vmem>>, vector<1x64x256xf32>
    %64 = vector.shape_cast %63 : vector<1x64x256xf32> to vector<64x256xf32>
    %65 = vector.shape_cast %62 : vector<64x256xf32> to vector<1x64x256xf32>
    tpu.vector_store %arg7[%c0_23, %c0_24, %c0_25], %65 {strides = array<i32>} : memref<1x64x256xf32, #tpu.memory_space<vmem>>, vector<1x64x256xf32>,
    return
  }
  func.func @transform_0(%arg0: i32) -> (i32, i32, i32) {
    %c0_i32 = arith.constant 0 : i32
    %c0_i32_0 = arith.constant 0 : i32
    %c0_i32_1 = arith.constant 0 : i32
    return %arg0, %c0_i32, %c0_i32_0 : i32, i32, i32
  }
  func.func @transform_1(%arg0: i32) -> (i32, i32) {
    %c0_i32 = arith.constant 0 : i32
    %c0_i32_0 = arith.constant 0 : i32
    %c0_i32_1 = arith.constant 0 : i32
    return %c0_i32, %c0_i32_0 : i32, i32
  }
  func.func @transform_2(%arg0: i32) -> (i32, i32) {
    %c0_i32 = arith.constant 0 : i32
    %c0_i32_0 = arith.constant 0 : i32
    %c0_i32_1 = arith.constant 0 : i32
    return %c0_i32, %c0_i32_0 : i32, i32
  }
  func.func @transform_3(%arg0: i32) -> (i32, i32) {
    %c0_i32 = arith.constant 0 : i32
    %c0_i32_0 = arith.constant 0 : i32
    %c0_i32_1 = arith.constant 0 : i32
    return %c0_i32, %c0_i32_0 : i32, i32
  }
  func.func @transform_4(%arg0: i32) -> (i32, i32) {
    %c0_i32 = arith.constant 0 : i32
    %c0_i32_0 = arith.constant 0 : i32
    %c0_i32_1 = arith.constant 0 : i32
    return %c0_i32, %c0_i32_0 : i32, i32
  }
  func.func @transform_5(%arg0: i32) -> (i32, i32) {
    %c0_i32 = arith.constant 0 : i32
    %c0_i32_0 = arith.constant 0 : i32
    %c0_i32_1 = arith.constant 0 : i32
    return %c0_i32, %c0_i32_0 : i32, i32
  }
  func.func @transform_6(%arg0: i32) -> (i32, i32, i32) {
    %c0_i32 = arith.constant 0 : i32
    %c0_i32_0 = arith.constant 0 : i32
    %c0_i32_1 = arith.constant 0 : i32
    return %arg0, %c0_i32, %c0_i32_0 : i32, i32, i32
  }
}

</mosaic_0001>

<bundles_post_ra>
// kernel: tpu_custom_call.1
= control target key start
LH: loop header
LB: loop body
LE: loop exit
PB: predicated region body
PF: predicated region fallthrough
CT: control target
= control target key end

     0   :  { %11 = vsyncpa [#allocation4], 0  ;;  %s4853_s0 = inlined_call_operand.vmem [shape: bf16[2,8,326], index: 0, kind: input, shape index: {}]   ;;  %s4854_s1 = inlined_call_operand.vmem [shape: bf16[64,72], index: 1, kind: input, shape index: {}]   ;;  %s4855_s2 = inlined_call_operand.vmem [shape: f32[64,1], index: 2, kind: input, shape index: {}]   ;;  %s4856_s3 = inlined_call_operand.hbm [shape: bf16[64,576], index: 3, kind: input, shape index: {}]   ;;  %s4857_s4 = inlined_call_operand.vmem [shape: f32[64,1], index: 4, kind: input, shape index: {}]   ;;  %s4858_s5 = inlined_call_operand.vmem [shape: f32[1,288], index: 5, kind: input, shape index: {}]   ;;  %s4859_s6 = inlined_call_operand.hbm [shape: f32[2,64,256], index: 6, kind: output, shape index: {}]  }
   0x1   :  { %12 = vsyncpa [#allocation5], 0 }
   0x2   :  { %14 = vsyncpa [#allocation5 + $0x1], 0  ;;  %s3099_s21 = smov 0   ;;  %s3101_s22 = smov 0  }
   0x3   :  { %s3103_s23 = smov 0   ;;  %s3105_s24 = smov 0  }
   0x4 LB: > { %s3120_s25 = sadd.s32 4294967295, %s3034_s24   ;;  %s2592_s26 = sadd.s32 4294967294, %s3034_s24   ;;  %s3034_s24 = sphi %s3105_s24, %s4925_s24   ;;  %s3030_s23 = sphi %s3103_s23, %s4924_s23   ;;  %s3026_s22 = sphi %s3101_s22, %s4923_s22   ;;  %s3022_s21 = sphi %s3099_s21, %s4922_s21  }
   0x5   : > { %s3124_s27 = sadd.s32 1, %s3034_s24   ;;  %s158_s28 = sadd.s32 1, %s3030_s23 }
   0x6   : > { %s155_s29 = ssub.s32 %s3034_s24, %s3124_s27  ;;  %p168_p0 = scmp.ne.s32.totalorder %s3030_s23, %s3026_s22 }
   0x7   : > { %p156_p1 = scmp.eq.s32.totalorder %s155_s29, 0  ;;  %p169_p2 = scmp.eq.s32.totalorder %s3120_s25, 1 }
   0x8   : > { %p174_p3 = scmp.ne.s32.totalorder %s3026_s22, %s3022_s21  ;;  %p175_p4 = scmp.eq.s32.totalorder %s2592_s26, 1 }
   0x9   : > { %s3135_s30 = scalar_select %p156_p1, %s3030_s23, %s158_s28  }
   0xa   : > { %p3137_p5 = por %p169_p2, %p168_p0  ;;  %p3141_p6 = por %p175_p4, %p174_p3 }
   0xb   : > { %p2593_p7 = scmp.ge.s32.totalorder %s3034_s24, 1  ;;  %p182_p8 = scmp.lt.s32.totalorder %s3034_s24, 3 }
   0xc   : > { %s4881_s8 = scalar_select %p3141_p6, 1, 0 }
   0xd   : > { %p2841_p9 = scmp.eq.s32.totalorder %s3120_s25, 0  ;;  %p3148_p10 = pnand %p2593_p7, %p182_p8 }
   0xe   : > { %s3036_s10 = smov [#allocation3]  }
   0xf   : > { %s200_s11 = sshll.u32 %s3036_s10, 4  ;;  %p2833_p11 = pneg %p3148_p10  ;;  %s201_s11 = int_to_ptr.vmem [resolvable:$true] %s200_s11 }
  0x10   : > { %s2955_s12 = scalar_lea.vmem %s201_s11, 2560  ;;  %p2963_p3 = scmp.lt.s32.totalorder %s201_s11, %s201_s11 }
  0x11   : > { %p2834_p12 = pnand %p2841_p9, %p2833_p11  ;;  %p2956_p0 = scmp.ne.s32.totalorder %s201_s11, %s2955_s12 }
  0x12   : > { %p2964_p4 = scmp.lt.s32.totalorder %s2955_s12, %s2955_s12 }
  0x13   : > { %p2946_p13 = pneg %p2834_p12 }
  0x14   : > { %p2965_p6 = por %p2964_p4, %p2963_p3 }
  0x15   : > { %p2958_p1 = pnand %p2956_p0, %p2946_p13 }
  0x17   : > { %p2959_p2 = pneg %p2958_p1 }
  0x19   : > { %p2966_p7 = pnand %p2965_p6, %p2959_p2 }
  0x1b   : > { %2969 = shalt.err (!%p2966_p7)
}
  0x1c   : > { %s3037_s13 = smov 320   ;;  %s3038_s14 = smov 20  }
  0x1d   : > { %2836 = dma.hbm_to_vmem [thread:$0]  (!%p2834_p12), %s4856_s3, 2560, %s201_s11, [#allocation4], %s3037_s13, %s3037_s13, %s3038_s14  }
  0x1e   : > { %230 = sbr.rel (%p3148_p10) target bundleno = 1458 (0x5b2), region = 44 }
  0x23   : > { %3013 = dma.done.wait (%p2841_p9), [#allocation4], 2560  }
  0x24   : > { %3015 = vsyncadd (%p2841_p9), [#allocation4], 4294964736  ;;  %p260_p8 = scmp.lt.s32.totalorder %s3120_s25, 1  ;;  %s4860_s28 = smov 90   ;;  %v3215_v4 = vld [vmem:[%s4854_s1] sm:$0xff]   ;;  %vm473_vm0 = vcmask 588800  }
  0x25   : > { %s4862_s29 = smov 92   ;;  %s4864_s9 = smov 91   ;;  %2801 = vmatprep.mubr.msk.bf16.mxu1 %vm473_vm0, %v3215_v4  ;;  %v4866_v5 = vmov 0   ;;  %v412_v6 = vld [vmem:[%s4855_s2 + $0x38] sm:$0xff]  ;;  %v411_v7 = vld [vmem:[%s4855_s2 + $0x30] sm:$0xff]  ;;  %v409_v8 = vld [vmem:[%s4855_s2 + $0x20] sm:$0xff] }
  0x26   : > { %s261_s17 = scalar_select %p260_p8, %s3120_s25, 1  ;;  %527 = vmatprep.mubr.bf16.mxu0 %v4866_v5  ;;  %2904 = vset.pattern.permute.xlu1 %v4866_v5  ;;  %v410_v9 = vld [vmem:[%s4855_s2 + $0x28] sm:$0xff]  ;;  %v407_v10 = vld [vmem:[%s4855_s2 + $0x10] sm:$0xff]  ;;  %v408_v11 = vld [vmem:[%s4855_s2 + $0x18] sm:$0xff]  ;;  %vm348_vm1 = vcmask 1043456   ;;  %vm345_vm2 = vcmask 736256  }
  0x27   : > { %s3042_s10 = smov 109   ;;  %s3043_s11 = smov 108   ;;  %2903 = vset.pattern.permute.xlu0 %v4866_v5  ;;  %v405_v12 = vld [vmem:[%s4855_s2] sm:$0xff]  ;;  %v406_v13 = vld [vmem:[%s4855_s2 + $0x8] sm:$0xff]  ;;  %vm327_vm3 = vcmask 752640   ;;  %vm336_vm4 = vcmask 744448  }
  0x28   : > { %s2826_s18 = smul.u32 12, %s261_s17  ;;  %s3044_s12 = smov 126   ;;  %vm309_vm5 = vcmask 891904   ;;  %vm318_vm6 = vcmask 883712   ;;  %vm291_vm7 = vcmask 1031168   ;;  %vm300_vm8 = vcmask 900096  }
  0x29   : > { %s3045_s13 = smov 110   ;;  %s3047_s16 = smov 127   ;;  %vm282_vm9 = vcmask 1039360   ;;  %vm698_vm10 = vcmask 150528   ;;  %vm707_vm11 = vcmask 568728   ;;  %vm853_vm12 = vcmask 1043608  }
  0x2a   : > { %s264_s26 = scalar_lea.vmem %s4853_s0, %s2826_s18  ;;  %699 = vst.msk [vmem:[#allocation2] sm:$0xf] %vm698_vm10, %v4866_v5  ;;  %700 = vst.msk [vmem:[#allocation2 + $0xc] sm:$0xf] %vm698_vm10, %v4866_v5  ;;  %vm854_vm13 = vcmask 1047556   ;;  %vm820_vm14 = vcmask 154624  }
  0x2b   : > { %v3170_v0 = vld [vmem:[%s264_s26 + $0x8] ss:$0 sps:$4 sm:$0xff]   ;;  %v266_v1 = vld [vmem:[%s264_s26] sm:$0xff]  ;;  %708 = vst.msk [vmem:[#allocation2 + $0x8] sm:$0xf] %vm707_vm11, %v4866_v5  ;;  %s3048_s26 = smov 19   ;;  %vm3416_vm15 = vmor %vm854_vm13, %vm853_vm12 }
  0x2c   : > { %v3172_v2 = vcombine.low %v266_v1, %v266_v1  ;;  %343 = vrot.lane.b32.xlu1 %v3170_v0, %s4860_s28  ;;  %v3176_v3 = vcombine.high %v266_v1, %v266_v1  ;;  %701 = vst.msk [vmem:[#allocation2 + $0x18] sm:$0xf] %vm698_vm10, %v4866_v5  ;;  %702 = vst.msk [vmem:[#allocation2 + $0x24] sm:$0xf] %vm698_vm10, %v4866_v5  ;;  %s4888_s14 = smov 91   ;;  %s3049_s17 = smov 114  }
  0x2d   : > { %703 = vst.msk [vmem:[#allocation2 + $0x30] sm:$0xf] %vm698_vm10, %v4866_v5  ;;  %704 = vst.msk [vmem:[#allocation2 + $0x3c] sm:$0xf] %vm698_vm10, %v4866_v5  ;;  %s3050_s18 = smov 124   ;;  %s4874_s19 = smov 122  }
  0x2e   : > { %339 = vrot.lane.b32.xlu0 %v3172_v2, %s4860_s28  ;;  %705 = vst.msk [vmem:[#allocation2 + $0x48] sm:$0xf] %vm698_vm10, %v4866_v5  ;;  %706 = vst.msk [vmem:[#allocation2 + $0x54] sm:$0xf] %vm698_vm10, %v4866_v5  ;;  %s3052_s20 = smov 120   ;;  %s4876_s15 = sand.u32 1, %s3026_s22  }
  0x2f   : > { %709 = vst.msk [vmem:[#allocation2 + $0x14] sm:$0xf] %vm707_vm11, %v4866_v5  ;;  %710 = vst.msk [vmem:[#allocation2 + $0x20] sm:$0xf] %vm707_vm11, %v4866_v5 }
  0x30   : > { %323 = vrot.lane.b32.xlu1 %v3176_v3, %s4862_s29  ;;  %711 = vst.msk [vmem:[#allocation2 + $0x2c] sm:$0xf] %vm707_vm11, %v4866_v5  ;;  %712 = vst.msk [vmem:[#allocation2 + $0x38] sm:$0xf] %vm707_vm11, %v4866_v5 }
  0x31   : > { %713 = vst.msk [vmem:[#allocation2 + $0x44] sm:$0xf] %vm707_vm11, %v4866_v5  ;;  %714 = vst.msk [vmem:[#allocation2 + $0x50] sm:$0xf] %vm707_vm11, %v4866_v5 }
  0x32   : > { %341 = vrot.lane.b32.xlu0 %v3176_v3, %s4860_s28  ;;  %715 = vst.msk [vmem:[#allocation2 + $0x5c] sm:$0xf] %vm707_vm11, %v4866_v5  ;;  %s3057_s28 = smov 104  }
  0x34   : > { %332 = vrot.lane.b32.xlu1 %v3176_v3, %s4864_s9 }
  0x36   : > { %325 = vrot.lane.b32.xlu0 %v3170_v0, %s4862_s29 }
  0x38   : > { %321 = vrot.lane.b32.xlu1 %v3172_v2, %s4862_s29  ;;  %s3058_s29 = smov 102  }
  0x3a   : > { %334 = vrot.lane.b32.xlu0 %v3170_v0, %s4864_s9 }
  0x3c   : > { %305 = vrot.lane.b32.xlu1 %v3176_v3, %s3042_s10 }
  0x3e   : > { %330 = vrot.lane.b32.xlu0 %v3172_v2, %s4864_s9  ;;  %s3059_s9 = smov 100  }
  0x40   : > { %314 = vrot.lane.b32.xlu1 %v3176_v3, %s3043_s11 }
  0x42   : > { %307 = vrot.lane.b32.xlu0 %v3170_v0, %s3042_s10 }
  0x44   : > { %303 = vrot.lane.b32.xlu1 %v3172_v2, %s3042_s10 }
  0x46   : > { %316 = vrot.lane.b32.xlu0 %v3170_v0, %s3043_s11 }
  0x48   : > { %287 = vrot.lane.b32.xlu1 %v3176_v3, %s3044_s12 }
  0x4a   : > { %312 = vrot.lane.b32.xlu0 %v3172_v2, %s3043_s11 }
  0x4c   : > { %296 = vrot.lane.b32.xlu1 %v3176_v3, %s3045_s13 }
  0x4e   : > { %289 = vrot.lane.b32.xlu0 %v3170_v0, %s3044_s12 }
  0x50   : > { %285 = vrot.lane.b32.xlu1 %v3172_v2, %s3044_s12 }
  0x52   : > { %298 = vrot.lane.b32.xlu0 %v3170_v0, %s3045_s13 }
  0x54   : > { %278 = vrot.lane.b32.xlu1 %v3176_v3, %s3047_s16 }
  0x56   : > { %294 = vrot.lane.b32.xlu0 %v3172_v2, %s3045_s13 }
  0x58   : > { %276 = vrot.lane.b32.xlu1 %v3172_v2, %s3047_s16 }
  0x5a   : > { %280 = vrot.lane.b32.xlu0 %v3170_v0, %s3047_s16 }
  0x5c   : > { %450 = vperm.xlu1 %2904, %v412_v6  }
  0x5e   : > { %445 = vperm.xlu0 %2903, %v411_v7  }
  0x60   : > { %435 = vperm.xlu1 %2904, %v409_v8  }
  0x62   : > { %440 = vperm.xlu0 %2903, %v410_v9   ;;  %v2909_v9 = vld [vmem:[%s4854_s1 + $0x8] sm:$0xff]  }
  0x64   : > { %425 = vperm.xlu1 %2904, %v407_v10   ;;  %v2910_v10 = vld [vmem:[%s4854_s1 + $0x10] sm:$0xff]  }
  0x66   : > { %430 = vperm.xlu0 %2903, %v408_v11  }
  0x68   : > { %415 = vperm.xlu1 %2904, %v405_v12  }
  0x6a   : > { %420 = vperm.xlu0 %2903, %v406_v13  }
  0x9e   : > { %v344_v14 = vpop.permute.xlu1 %343 }
  0x9f   : > { %2825 = vmatprep.subr.msk.bf16.mxu1 %vm348_vm1, %v344_v14  ;;  %v493_v16 = vsel %vm348_vm1, %v344_v14, 0 }
  0xa0   : > { %v340_v15 = vpop.permute.xlu0 %339  ;;  %2792 = vmatpush3.bf16.msra.mxu1 %v493_v16  ;;  %v657_v16 = vld [vmem:[%s4858_s5] sm:$0x7] }
  0xa2   : > { %v324_v17 = vpop.permute.xlu1 %323 }
  0xa4   : > { %v342_v18 = vpop.permute.xlu0 %341 }
  0xa5   : > { %v347_v19 = vsel %vm345_vm2, %v342_v18, %v344_v14  ;;  %v346_v20 = vsel %vm345_vm2, %v340_v15, %v342_v18 }
  0xa6   : > { %2607 = vmatprep.subr.msk.bf16.mxu0 %vm348_vm1, %v347_v19  ;;  %v487_v21 = vsel %vm348_vm1, %v346_v20, 0  ;;  %v333_v22 = vpop.permute.xlu1 %332 }
  0xa7   : > { %502 = vmatpush1.bf16.msra.mxu0 %v487_v21 }
  0xa8   : > { %v326_v23 = vpop.permute.xlu0 %325 }
  0xa9   : > { %v329_v26 = vsel %vm327_vm3, %v324_v17, %v326_v23 }
  0xaa   : > { %v322_v24 = vpop.permute.xlu1 %321 }
  0xab   : > { %v328_v32 = vsel %vm327_vm3, %v322_v24, %v324_v17 }
  0xac   : > { %v335_v25 = vpop.permute.xlu0 %334 }
  0xad   : > { %v338_v27 = vsel %vm336_vm4, %v333_v22, %v335_v25  ;;  %v395_v28 = vsel %vm348_vm1, %v326_v23, %v335_v25 }
  0xae   : > { %2793 = vmatprep.subr.bf16.mxu1 %v395_v28  ;;  %v391_v29 = vsel %vm348_vm1, %v329_v26, %v338_v27  ;;  %v306_v30 = vpop.permute.xlu1 %305 }
  0xaf   : > { %503 = vmatprep.subr.bf16.mxu0 %v391_v29  ;;  %2794 = vmatpush3.bf16.msra.mxu1 %v395_v28 }
  0xb0   : > { %v331_v31 = vpop.permute.xlu0 %330 }
  0xb1   : > { %v337_v33 = vsel %vm336_vm4, %v331_v31, %v333_v22 }
  0xb2   : > { %v387_v34 = vsel %vm348_vm1, %v328_v32, %v337_v33  ;;  %v315_v35 = vpop.permute.xlu1 %314 }
  0xb3   : > { %504 = vmatpush1.bf16.msra.mxu0 %v387_v34 }
  0xb4   : > { %v308_v36 = vpop.permute.xlu0 %307 }
  0xb5   : > { %v311_v39 = vsel %vm309_vm5, %v306_v30, %v308_v36 }
  0xb6   : > { %v304_v37 = vpop.permute.xlu1 %303 }
  0xb7   : > { %v310_v45 = vsel %vm309_vm5, %v304_v37, %v306_v30 }
  0xb8   : > { %v317_v38 = vpop.permute.xlu0 %316 }
  0xb9   : > { %v320_v40 = vsel %vm318_vm6, %v315_v35, %v317_v38  ;;  %v383_v41 = vsel %vm348_vm1, %v308_v36, %v317_v38 }
  0xba   : > { %2795 = vmatprep.subr.bf16.mxu1 %v383_v41  ;;  %v379_v42 = vsel %vm348_vm1, %v311_v39, %v320_v40  ;;  %v288_v43 = vpop.permute.xlu1 %287 }
  0xbb   : > { %505 = vmatprep.subr.bf16.mxu0 %v379_v42  ;;  %2796 = vmatpush3.bf16.msra.mxu1 %v383_v41 }
  0xbc   : > { %v313_v44 = vpop.permute.xlu0 %312 }
  0xbd   : > { %v319_v46 = vsel %vm318_vm6, %v313_v44, %v315_v35 }
  0xbe   : > { %v375_v47 = vsel %vm348_vm1, %v310_v45, %v319_v46  ;;  %v297_v48 = vpop.permute.xlu1 %296 }
  0xbf   : > { %506 = vmatpush1.bf16.msra.mxu0 %v375_v47 }
  0xc0   : > { %v290_v49 = vpop.permute.xlu0 %289 }
  0xc1   : > { %v293_v52 = vsel %vm291_vm7, %v288_v43, %v290_v49 }
  0xc2   : > { %v286_v50 = vpop.permute.xlu1 %285 }
  0xc3   : > { %v292_v58 = vsel %vm291_vm7, %v286_v50, %v288_v43 }
  0xc4   : > { %v299_v51 = vpop.permute.xlu0 %298 }
  0xc5   : > { %v302_v53 = vsel %vm300_vm8, %v297_v48, %v299_v51  ;;  %v371_v54 = vsel %vm348_vm1, %v290_v49, %v299_v51 }
  0xc6   : > { %2797 = vmatprep.subr.bf16.mxu1 %v371_v54  ;;  %v367_v55 = vsel %vm348_vm1, %v293_v52, %v302_v53  ;;  %v279_v56 = vpop.permute.xlu1 %278 }
  0xc7   : > { %507 = vmatprep.subr.bf16.mxu0 %v367_v55  ;;  %2798 = vmatpush3.bf16.msra.mxu1 %v371_v54 }
  0xc8   : > { %v295_v57 = vpop.permute.xlu0 %294 }
  0xc9   : > { %v301_v59 = vsel %vm300_vm8, %v295_v57, %v297_v48 }
  0xca   : > { %v363_v60 = vsel %vm348_vm1, %v292_v58, %v301_v59  ;;  %v277_v61 = vpop.permute.xlu1 %276 }
  0xcb   : > { %508 = vmatpush1.bf16.msra.mxu0 %v363_v60  ;;  %v283_v63 = vsel %vm282_vm9, %v277_v61, %v279_v56 }
  0xcc   : > { %v281_v62 = vpop.permute.xlu0 %280  ;;  %v351_v7 = vsel %vm348_vm1, %v3172_v2, %v283_v63 }
  0xcd   : > { %v284_v1 = vsel %vm282_vm9, %v279_v56, %v281_v62  ;;  %v359_v6 = vsel %vm348_vm1, %v3170_v0, %v281_v62  ;;  %v2911_v0 = vld [vmem:[%s4854_s1 + $0x18] sm:$0xff]  }
  0xce   : > { %2799 = vmatprep.subr.bf16.mxu1 %v359_v6  ;;  %v355_v8 = vsel %vm348_vm1, %v3176_v3, %v284_v1  ;;  %vm1429_vm1 = vcmask 523264  }
  0xcf   : > { %509 = vmatprep.subr.bf16.mxu0 %v355_v8  ;;  %2800 = vmatpush3.bf16.msra.mxu1 %v359_v6 }
  0xd0   : > { %510 = vmatpush1.bf16.msra.mxu0 %v351_v7 }
  0xd2   : > { %2802 = vmatmul.mubr.msk.bf16.vlgmr.msra.gmra.mxu1 %vm473_vm0, %v2909_v9 }
  0xd3   : > { %2608 = vmatmul.mubr.msk.bf16.vlgmr.msra.gmra.mxu0 %vm473_vm0, %v3215_v4  ;;  %2805 = vmatprep.mubr.msk.bf16.mxu1 %vm473_vm0, %v2910_v10  ;;  %v659_v4 = vlaneseq }
  0xd4   : > { %537 = vmatprep.mubr.bf16.mxu0 %v4866_v5 }
  0xd5   : > { %v660_v12 = vshrl.u32 %v659_v4, 7 }
  0xd7   : > { %v3313_v2 = vpop.permute.xlu1 %450  ;;  %v669_v15 = vsub.s32 2, %v660_v12  ;;  %v665_v24 = vsub.s32 1, %v660_v12  ;;  %v661_v29 = vsub.s32 0, %v660_v12 }
  0xd9   : > { %v3315_v3 = vpop.permute.xlu0 %445  ;;  %v3353_v20 = vrot.slane %v657_v16, %v669_v15  ;;  %v3357_v38 = vrot.slane %v657_v16, %v665_v24  ;;  %v3360_v46 = vrot.slane %v657_v16, %v661_v29 }
  0xda   : > { %2806 = vmatmul.mubr.msk.bf16.gmra.mxu1 %vm473_vm0, %v2911_v0 }
  0xdb   : > { %2609 = vmatmul.mubr.msk.bf16.gmra.mxu0 %vm473_vm0, %v2909_v9  ;;  %v3317_v11 = vpop.permute.xlu1 %435 }
  0xdc   : > { %547 = vmatprep.mubr.bf16.mxu0 %v4866_v5 }
  0xdd   : > { %v3319_v13 = vpop.permute.xlu0 %440 }
  0xdf   : > { %v3321_v14 = vpop.permute.xlu1 %425 }
  0xe1   : > { %v3326_v17 = vpop.permute.xlu0 %430 }
  0xe3   : > { %2610 = vmatmul.mubr.msk.bf16.gmra.mxu0 %vm473_vm0, %v2910_v10  ;;  %v416_v22 = vpop.permute.xlu1 %415 }
  0xe4   : > { %557 = vmatprep.mubr.bf16.mxu0 %v4866_v5 }
  0xe5   : > { %v421_v36 = vpop.permute.xlu0 %420 }
  0xeb   : > { %2611 = vmatmul.mubr.msk.bf16.gmra.mxu0 %vm473_vm0, %v2911_v0  ;;  %vm857_vm0 = vcmask 412672  }
 0x192   : > { %v2803_v18 = vpop.f32.mrf.mxu1 }
 0x193   : > { %v611_v19 = vadd.f32 %v2803_v18, %v3321_v14  ;;  %v529_v21 = vpop.f32.mrf.mxu0 }
 0x194   : > { %v602_v23 = vpop.f32.mrf.mxu1  ;;  %v530_v28 = vadd.f32 %v529_v21, %v416_v22 }
 0x195   : > { %v641_v25 = vmax.f32 %v611_v19, 0.0  ;;  %v603_v26 = vadd.f32 %v602_v23, %v416_v22  ;;  %v531_v27 = vpop.f32.mrf.mxu0 }
 0x196   : > { %v532_v30 = vadd.f32 %v531_v27, %v416_v22  ;;  %v2804_v31 = vpop.f32.mrf.mxu1  ;;  %v633_v45 = vmax.f32 %v530_v28, 0.0 }
 0x197   : > { %v682_v32 = vmul.f32 %v3353_v20, %v641_v25  ;;  %v635_v33 = vmax.f32 %v603_v26, 0.0  ;;  %v614_v34 = vadd.f32 %v2804_v31, %v3326_v17  ;;  %v533_v35 = vpop.f32.mrf.mxu0 }
 0x198   : > { %v634_v37 = vmax.f32 %v532_v30, 0.0  ;;  %v605_v39 = vpop.f32.mrf.mxu1  ;;  %v534_v47 = vadd.f32 %v533_v35, %v421_v36  ;;  %v674_v63 = vmul.f32 %v3360_v46, %v633_v45 }
 0x199   : > { %v2682_v40 = vpack.c.bf16 %v682_v32, %v682_v32  ;;  %v676_v41 = vmul.f32 %v3353_v20, %v635_v33  ;;  %v644_v42 = vmax.f32 %v614_v34, 0.0  ;;  %v606_v43 = vadd.f32 %v605_v39, %v421_v36  ;;  %v535_v44 = vpop.f32.mrf.mxu0 }
 0x19a   : > { %v536_v48 = vadd.f32 %v535_v44, %v421_v36  ;;  %v2807_v49 = vpop.f32.mrf.mxu1  ;;  %v675_v55 = vmul.f32 %v3357_v38, %v634_v37  ;;  %v636_v1 = vmax.f32 %v534_v47, 0.0 }
 0x19b   : > { %v685_v50 = vmul.f32 %v3353_v20, %v644_v42  ;;  %v638_v51 = vmax.f32 %v606_v43, 0.0  ;;  %v627_v52 = vadd.f32 %v2807_v49, %v3315_v3  ;;  %790 = vrot.lane.b32.xlu1 %v2682_v40, %s3048_s26  ;;  %v539_v53 = vpop.f32.mrf.mxu0  ;;  %v2678_v54 = vpack.c.bf16 %v676_v41, %v676_v41 }
 0x19c   : > { %v637_v56 = vmax.f32 %v536_v48, 0.0  ;;  %v618_v57 = vpop.f32.mrf.mxu1  ;;  %v2677_v12 = vpack.c.bf16 %v675_v55, %v674_v63  ;;  %v677_v22 = vmul.f32 %v3360_v46, %v636_v1  ;;  %v540_v23 = vadd.f32 %v539_v53, %v3321_v14 }
 0x19d   : > { %v2684_v58 = vpack.c.bf16 %v685_v50, %v685_v50  ;;  %v679_v59 = vmul.f32 %v3353_v20, %v638_v51  ;;  %v653_v60 = vmax.f32 %v627_v52, 0.0  ;;  %v619_v61 = vadd.f32 %v618_v57, %v3317_v11  ;;  %v541_v62 = vpop.f32.mrf.mxu0 }
 0x19e   : > { %v2808_v6 = vpop.f32.mrf.mxu1  ;;  %v678_v9 = vmul.f32 %v3357_v38, %v637_v56  ;;  %v542_v0 = vadd.f32 %v541_v62, %v3321_v14  ;;  %v639_v33 = vmax.f32 %v540_v23, 0.0 }
 0x19f   : > { %v630_v7 = vadd.f32 %v2808_v6, %v3313_v2  ;;  %782 = vrot.lane.b32.xlu1 %v2678_v54, %s3048_s26  ;;  %v543_v8 = vpop.f32.mrf.mxu0  ;;  %794 = vrot.lane.b32.xlu0 %v2684_v58, %s3048_s26  ;;  %v647_v10 = vmax.f32 %v619_v61, 0.0  ;;  %v2680_v15 = vpack.c.bf16 %v679_v59, %v679_v59  ;;  %v694_v16 = vmul.f32 %v3353_v20, %v653_v60 }
 0x1a0   : > { %v621_v4 = vpop.f32.mrf.mxu1  ;;  %v640_v26 = vmax.f32 %v542_v0, 0.0  ;;  %v2679_v27 = vpack.c.bf16 %v678_v9, %v677_v22  ;;  %v544_v14 = vadd.f32 %v543_v8, %v3326_v17  ;;  %v680_v45 = vmul.f32 %v3360_v46, %v639_v33 }
 0x1a1   : > { %v656_v18 = vmax.f32 %v630_v7, 0.0  ;;  %v622_v19 = vadd.f32 %v621_v4, %v3319_v13  ;;  %v545_v21 = vpop.f32.mrf.mxu0  ;;  %v688_v25 = vmul.f32 %v3353_v20, %v647_v10  ;;  %v2690_v28 = vpack.c.bf16 %v694_v16, %v694_v16 }
 0x1a2   : > { %v546_v31 = vadd.f32 %v545_v21, %v3326_v17  ;;  %v681_v39 = vmul.f32 %v3357_v38, %v640_v26  ;;  %v642_v47 = vmax.f32 %v544_v14, 0.0 }
 0x1a3   : > { %v549_v24 = vpop.f32.mrf.mxu0  ;;  %780 = vrot.lane.b32.xlu1 %v2677_v12, %s3048_s26  ;;  %786 = vrot.lane.b32.xlu0 %v2680_v15, %s3048_s26  ;;  %v697_v29 = vmul.f32 %v3353_v20, %v656_v18  ;;  %v650_v30 = vmax.f32 %v622_v19, 0.0  ;;  %v2686_v37 = vpack.c.bf16 %v688_v25, %v688_v25 }
 0x1a4   : > { %v550_v35 = vadd.f32 %v549_v24, %v3317_v11  ;;  %v643_v42 = vmax.f32 %v546_v31, 0.0  ;;  %v2681_v51 = vpack.c.bf16 %v681_v39, %v680_v45 }
 0x1a5   : > { %v551_v32 = vpop.f32.mrf.mxu0  ;;  %v2692_v40 = vpack.c.bf16 %v697_v29, %v697_v29  ;;  %v691_v41 = vmul.f32 %v3353_v20, %v650_v30 }
 0x1a6   : > { %v552_v34 = vadd.f32 %v551_v32, %v3317_v11  ;;  %v645_v11 = vmax.f32 %v550_v35, 0.0  ;;  %v684_v52 = vmul.f32 %v3357_v38, %v643_v42 }
 0x1a7   : > { %v553_v36 = vpop.f32.mrf.mxu0  ;;  %806 = vrot.lane.b32.xlu1 %v2690_v28, %s3048_s26  ;;  %784 = vrot.lane.b32.xlu0 %v2679_v27, %s3048_s26  ;;  %v2688_v20 = vpack.c.bf16 %v691_v41, %v691_v41 }
 0x1a8   : > { %v646_v43 = vmax.f32 %v552_v34, 0.0  ;;  %v554_v48 = vadd.f32 %v553_v36, %v3319_v13  ;;  %v686_v58 = vmul.f32 %v3360_v46, %v645_v11 }
 0x1a9   : > { %v555_v44 = vpop.f32.mrf.mxu0 }
 0x1aa   : > { %v556_v17 = vadd.f32 %v555_v44, %v3319_v13  ;;  %v687_v53 = vmul.f32 %v3357_v38, %v646_v43  ;;  %v683_v13 = vmul.f32 %v3360_v46, %v642_v47  ;;  %v648_v59 = vmax.f32 %v554_v48, 0.0 }
 0x1ab   : > { %v559_v49 = vpop.f32.mrf.mxu0  ;;  %798 = vrot.lane.b32.xlu1 %v2686_v37, %s3048_s26  ;;  %810 = vrot.lane.b32.xlu0 %v2692_v40, %s3048_s26 }
 0x1ac   : > { %v560_v50 = vadd.f32 %v559_v49, %v3315_v3  ;;  %v649_v54 = vmax.f32 %v556_v17, 0.0  ;;  %v2685_v6 = vpack.c.bf16 %v687_v53, %v686_v58  ;;  %v2683_v7 = vpack.c.bf16 %v684_v52, %v683_v13 }
 0x1ad   : > { %v561_v55 = vpop.f32.mrf.mxu0  ;;  %v689_v0 = vmul.f32 %v3360_v46, %v648_v59 }
 0x1ae   : > { %v651_v56 = vmax.f32 %v560_v50, 0.0  ;;  %v562_v57 = vadd.f32 %v561_v55, %v3315_v3  ;;  %v690_v63 = vmul.f32 %v3357_v38, %v649_v54 }
 0x1af   : > { %v563_v60 = vpop.f32.mrf.mxu0  ;;  %788 = vrot.lane.b32.xlu1 %v2681_v51, %s3048_s26  ;;  %802 = vrot.lane.b32.xlu0 %v2688_v20, %s3048_s26 }
 0x1b0   : > { %v652_v61 = vmax.f32 %v562_v57, 0.0  ;;  %v564_v62 = vadd.f32 %v563_v60, %v3313_v2  ;;  %v692_v3 = vmul.f32 %v3360_v46, %v651_v56  ;;  %v2687_v15 = vpack.c.bf16 %v690_v63, %v689_v0 }
 0x1b1   : > { %v565_v1 = vpop.f32.mrf.mxu0 }
 0x1b2   : > { %v693_v8 = vmul.f32 %v3357_v38, %v652_v61  ;;  %v654_v9 = vmax.f32 %v564_v62, 0.0  ;;  %v566_v10 = vadd.f32 %v565_v1, %v3313_v2 }
 0x1b3   : > { %796 = vrot.lane.b32.xlu1 %v2685_v6, %s3048_s26  ;;  %792 = vrot.lane.b32.xlu0 %v2683_v7, %s3048_s26 }
 0x1b4   : > { %v655_v4 = vmax.f32 %v566_v10, 0.0  ;;  %v2689_v12 = vpack.c.bf16 %v693_v8, %v692_v3  ;;  %v695_v16 = vmul.f32 %v3360_v46, %v654_v9 }
 0x1b6   : > { %v696_v18 = vmul.f32 %v3357_v38, %v655_v4 }
 0x1b7   : > { %804 = vrot.lane.b32.xlu1 %v2689_v12, %s3048_s26  ;;  %800 = vrot.lane.b32.xlu0 %v2687_v15, %s3048_s26 }
 0x1b8   : > { %v2691_v19 = vpack.c.bf16 %v696_v18, %v695_v16 }
 0x1bb   : > { %808 = vrot.lane.b32.xlu0 %v2691_v19, %s3048_s26  ;;  %s3053_s26 = smov 118  }
 0x20d   : > { %v791_v2 = vpop.permute.xlu1 %790 }
 0x211   : > { %v783_v21 = vpop.permute.xlu1 %782  ;;  %v795_v22 = vpop.permute.xlu0 %794 }
 0x215   : > { %v781_v23 = vpop.permute.xlu1 %780  ;;  %v787_v24 = vpop.permute.xlu0 %786 }
 0x216   : > { %v812_v38 = vrot.slane %v781_v23, 4 }
 0x218   : > { %v821_v46 = vsel %vm820_vm14, %v812_v38, %v781_v23  ;;  %v822_v26 = vsel %vm820_vm14, %v812_v38, %v783_v21 }
 0x219   : > { %856 = vst.msk [vmem:[#allocation2] sm:$0xff] %vm3416_vm15, %v821_v46  ;;  %v807_v27 = vpop.permute.xlu1 %806  ;;  %v785_v28 = vpop.permute.xlu0 %784 }
 0x21a   : > { %858 = vst.msk [vmem:[#allocation2 + $0x8] sm:$0xf] %vm857_vm0, %v822_v26  ;;  %v813_v29 = vrot.slane %v785_v28, 4 }
 0x21c   : > { %v823_v30 = vsel %vm820_vm14, %v813_v29, %v785_v28  ;;  %v824_v31 = vsel %vm820_vm14, %v813_v29, %v787_v24 }
 0x21d   : > { %859 = vst.msk [vmem:[#allocation2 + $0xc] sm:$0xff] %vm3416_vm15, %v823_v30  ;;  %v799_v32 = vpop.permute.xlu1 %798  ;;  %v811_v33 = vpop.permute.xlu0 %810 }
 0x21e   : > { %860 = vst.msk [vmem:[#allocation2 + $0x14] sm:$0xf] %vm857_vm0, %v824_v31 }
 0x220   : > { %v873_v36 = vld [vmem:[#allocation2] sm:$0xff] }
 0x221   : > { %v789_v34 = vpop.permute.xlu1 %788  ;;  %v803_v14 = vpop.permute.xlu0 %802 }
 0x222   : > { %v814_v35 = vrot.slane %v789_v34, 4 }
 0x224   : > { %v875_v37 = vld [vmem:[#allocation2 + $0xc] sm:$0xff]  ;;  %v825_v39 = vsel %vm820_vm14, %v814_v35, %v789_v34  ;;  %v826_v40 = vsel %vm820_vm14, %v814_v35, %v791_v2  ;;  %v3668_v34 = vld [vmem:[#allocation3 + $0x4] ss:$20 sps:$4 sm:$0xff]  }
 0x225   : > { %861 = vst.msk [vmem:[#allocation2 + $0x18] sm:$0xff] %vm3416_vm15, %v825_v39  ;;  %v797_v41 = vpop.permute.xlu1 %796  ;;  %v793_v42 = vpop.permute.xlu0 %792  ;;  %v3435_v43 = vcombine.high %v873_v36, %v875_v37  ;;  %v3437_v44 = vcombine.low %v873_v36, %v875_v37  ;;  %v3453_v20 = vld [vmem:[#allocation2 + $0x8] ss:$12 sps:$4 sm:$0xff]   ;;  %4892 = vst [vmem:[#allocation14_spill] sm:$0xff] %v3668_v34  ;;  %1474 = vmatprep.mubr.bf16.mxu0 %v3668_v34 }
 0x226   : > { %862 = vst.msk [vmem:[#allocation2 + $0x20] sm:$0xf] %vm857_vm0, %v826_v40  ;;  %v816_v45 = vrot.slane %v797_v41, 4  ;;  %v815_v17 = vrot.slane %v793_v42, 4  ;;  %4885 = vst [vmem:[#allocation9_spill] sm:$0xff] %v3453_v20 }
 0x227   : > { %955 = vrot.lane.b32.xlu0 %v3435_v43, %s3047_s16  ;;  %953 = vrot.lane.b32.xlu1 %v3437_v44, %s3047_s16 }
 0x228   : > { %v829_v47 = vsel %vm820_vm14, %v816_v45, %v797_v41  ;;  %v830_v11 = vsel %vm820_vm14, %v816_v45, %v799_v32  ;;  %v827_v48 = vsel %vm820_vm14, %v815_v17, %v793_v42  ;;  %v828_v49 = vsel %vm820_vm14, %v815_v17, %v795_v22 }
 0x229   : > { %865 = vst.msk [vmem:[#allocation2 + $0x30] sm:$0xff] %vm3416_vm15, %v829_v47  ;;  %863 = vst.msk [vmem:[#allocation2 + $0x24] sm:$0xff] %vm3416_vm15, %v827_v48  ;;  %v805_v50 = vpop.permute.xlu1 %804  ;;  %v801_v51 = vpop.permute.xlu0 %800  ;;  %v3711_v47 = vld [vmem:[#allocation3 + $0xc] ss:$20 sps:$4 sm:$0xff]  }
 0x22a   : > { %866 = vst.msk [vmem:[#allocation2 + $0x38] sm:$0xf] %vm857_vm0, %v830_v11  ;;  %864 = vst.msk [vmem:[#allocation2 + $0x2c] sm:$0xf] %vm857_vm0, %v828_v49  ;;  %v818_v52 = vrot.slane %v805_v50, 4  ;;  %v817_v53 = vrot.slane %v801_v51, 4  ;;  %1547 = vmatprep.mubr.bf16.mxu1 %v3711_v47 }
 0x22b   : > { %999 = vrot.lane.b32.xlu0 %v3435_v43, %s3044_s12  ;;  %957 = vrot.lane.b32.xlu1 %v3453_v20, %s3047_s16  ;;  %4893 = vst [vmem:[#allocation15_spill] sm:$0xff] %v3711_v47 }
 0x22c   : > { %v833_v54 = vsel %vm820_vm14, %v818_v52, %v805_v50  ;;  %v834_v55 = vsel %vm820_vm14, %v818_v52, %v807_v27  ;;  %v831_v56 = vsel %vm820_vm14, %v817_v53, %v801_v51  ;;  %v832_v57 = vsel %vm820_vm14, %v817_v53, %v803_v14  ;;  %v877_v62 = vld [vmem:[#allocation2 + $0x18] sm:$0xff] }
 0x22d   : > { %869 = vst.msk [vmem:[#allocation2 + $0x48] sm:$0xff] %vm3416_vm15, %v833_v54  ;;  %867 = vst.msk [vmem:[#allocation2 + $0x3c] sm:$0xff] %vm3416_vm15, %v831_v56  ;;  %v809_v13 = vpop.permute.xlu0 %808 }
 0x22e   : > { %870 = vst.msk [vmem:[#allocation2 + $0x50] sm:$0xf] %vm857_vm0, %v834_v55  ;;  %868 = vst.msk [vmem:[#allocation2 + $0x44] sm:$0xf] %vm857_vm0, %v832_v57  ;;  %v819_v58 = vrot.slane %v809_v13, 4  ;;  %v2408_v57 = vld [vmem:[%s4857_s4] sm:$0xff] }
 0x22f   : > { %1133 = vrot.lane.b32.xlu0 %v3453_v20, %s3043_s11  ;;  %997 = vrot.lane.b32.xlu1 %v3437_v44, %s3044_s12 }
 0x230   : > { %v835_v59 = vsel %vm820_vm14, %v819_v58, %v809_v13  ;;  %v836_v60 = vsel %vm820_vm14, %v819_v58, %v811_v33  ;;  %v879_v61 = vld [vmem:[#allocation2 + $0x24] sm:$0xff]  ;;  %v881_v3 = vld [vmem:[#allocation2 + $0x30] sm:$0xff] }
 0x231   : > { %871 = vst.msk [vmem:[#allocation2 + $0x54] sm:$0xff] %vm3416_vm15, %v835_v59  ;;  %v3494_v63 = vcombine.low %v877_v62, %v879_v61  ;;  %v3500_v1 = vcombine.high %v877_v62, %v879_v61  ;;  %v3502_v6 = vld [vmem:[#allocation2 + $0x20] ss:$12 sps:$4 sm:$0xff]   ;;  %v2411_v61 = vld [vmem:[%s4857_s4 + $0x18] sm:$0xff] }
 0x232   : > { %872 = vst.msk [vmem:[#allocation2 + $0x5c] sm:$0xf] %vm857_vm0, %v836_v60  ;;  %4886 = vst [vmem:[#allocation10_spill] sm:$0xff] %v3502_v6  ;;  %v2409_v13 = vld [vmem:[%s4857_s4 + $0x8] sm:$0xff]  ;;  %v2410_v60 = vld [vmem:[%s4857_s4 + $0x10] sm:$0xff] }
 0x233   : > { %1129 = vrot.lane.b32.xlu0 %v3437_v44, %s3043_s11  ;;  %1001 = vrot.lane.b32.xlu1 %v3453_v20, %s3044_s12 }
 0x234   : > { %v883_v7 = vld [vmem:[#allocation2 + $0x3c] sm:$0xff]  ;;  %v885_v4 = vld [vmem:[#allocation2 + $0x48] sm:$0xff] }
 0x235   : > { %v3532_v8 = vld [vmem:[#allocation2 + $0x38] ss:$12 sps:$4 sm:$0xff]   ;;  %v3534_v9 = vcombine.low %v881_v3, %v883_v7  ;;  %v3540_v10 = vcombine.high %v881_v3, %v883_v7 }
 0x236   : > { %4887 = vst [vmem:[#allocation11_spill] sm:$0xff] %v3532_v8  ;;  %v2412_v3 = vld [vmem:[%s4857_s4 + $0x20] sm:$0xff] }
 0x237   : > { %1045 = vrot.lane.b32.xlu0 %v3453_v20, %s3045_s13  ;;  %1131 = vrot.lane.b32.xlu1 %v3435_v43, %s3043_s11 }
 0x238   : > { %v887_v0 = vld [vmem:[#allocation2 + $0x54] sm:$0xff] }
 0x239   : > { %v3566_v12 = vcombine.high %v885_v4, %v887_v0  ;;  %v3576_v15 = vld [vmem:[#allocation2 + $0x50] ss:$12 sps:$4 sm:$0xff]   ;;  %v3578_v16 = vcombine.low %v885_v4, %v887_v0  ;;  %v2413_v0 = vld [vmem:[%s4857_s4 + $0x28] sm:$0xff] }
 0x23a   : > { %4889 = vst [vmem:[#allocation12_spill] sm:$0xff] %v3576_v15 }
 0x23b   : > { %1089 = vrot.lane.b32.xlu0 %v3453_v20, %s3042_s10  ;;  %1043 = vrot.lane.b32.xlu1 %v3435_v43, %s3045_s13 }
 0x23f   : > { %1085 = vrot.lane.b32.xlu0 %v3437_v44, %s3042_s10  ;;  %1041 = vrot.lane.b32.xlu1 %v3437_v44, %s3045_s13 }
 0x243   : > { %1087 = vrot.lane.b32.xlu1 %v3435_v43, %s3042_s10  ;;  %959 = vrot.lane.b32.xlu0 %v3494_v63, %s3047_s16 }
 0x247   : > { %961 = vrot.lane.b32.xlu1 %v3500_v1, %s3047_s16  ;;  %963 = vrot.lane.b32.xlu0 %v3502_v6, %s3047_s16 }
 0x24b   : > { %1005 = vrot.lane.b32.xlu1 %v3500_v1, %s3044_s12  ;;  %1003 = vrot.lane.b32.xlu0 %v3494_v63, %s3044_s12 }
 0x24f   : > { %1139 = vrot.lane.b32.xlu1 %v3502_v6, %s3043_s11  ;;  %1137 = vrot.lane.b32.xlu0 %v3500_v1, %s3043_s11 }
 0x253   : > { %1049 = vrot.lane.b32.xlu1 %v3500_v1, %s3045_s13  ;;  %1135 = vrot.lane.b32.xlu0 %v3494_v63, %s3043_s11 }
 0x257   : > { %1047 = vrot.lane.b32.xlu1 %v3494_v63, %s3045_s13  ;;  %1051 = vrot.lane.b32.xlu0 %v3502_v6, %s3045_s13 }
 0x25b   : > { %1093 = vrot.lane.b32.xlu1 %v3500_v1, %s3042_s10  ;;  %1095 = vrot.lane.b32.xlu0 %v3502_v6, %s3042_s10 }
 0x25f   : > { %1007 = vrot.lane.b32.xlu1 %v3502_v6, %s3044_s12  ;;  %1091 = vrot.lane.b32.xlu0 %v3494_v63, %s3042_s10 }
 0x263   : > { %969 = vrot.lane.b32.xlu0 %v3532_v8, %s3047_s16  ;;  %965 = vrot.lane.b32.xlu1 %v3534_v9, %s3047_s16 }
 0x267   : > { %1145 = vrot.lane.b32.xlu0 %v3532_v8, %s3043_s11  ;;  %967 = vrot.lane.b32.xlu1 %v3540_v10, %s3047_s16 }
 0x26b   : > { %1057 = vrot.lane.b32.xlu0 %v3532_v8, %s3045_s13  ;;  %1143 = vrot.lane.b32.xlu1 %v3540_v10, %s3043_s11 }
 0x26f   : > { %1101 = vrot.lane.b32.xlu0 %v3532_v8, %s3042_s10  ;;  %1141 = vrot.lane.b32.xlu1 %v3534_v9, %s3043_s11 }
 0x273   : > { %1097 = vrot.lane.b32.xlu0 %v3534_v9, %s3042_s10  ;;  %1055 = vrot.lane.b32.xlu1 %v3540_v10, %s3045_s13 }
 0x277   : > { %1013 = vrot.lane.b32.xlu0 %v3532_v8, %s3044_s12  ;;  %1053 = vrot.lane.b32.xlu1 %v3534_v9, %s3045_s13 }
 0x27b   : > { %1231 = vrot.lane.b32.xlu0 %v3540_v10, %s4888_s14  ;;  %1099 = vrot.lane.b32.xlu1 %v3540_v10, %s3042_s10 }
 0x27f   : > { %1011 = vrot.lane.b32.xlu1 %v3540_v10, %s3044_s12  ;;  %973 = vrot.lane.b32.xlu0 %v3566_v12, %s3047_s16 }
 0x283   : > { %1009 = vrot.lane.b32.xlu1 %v3534_v9, %s3044_s12  ;;  %1229 = vrot.lane.b32.xlu0 %v3534_v9, %s4888_s14 }
 0x287   : > { %975 = vrot.lane.b32.xlu1 %v3576_v15, %s3047_s16  ;;  %971 = vrot.lane.b32.xlu0 %v3578_v16, %s3047_s16  ;;  %s4890_s16 = smov 92  }
 0x28b   : > { %1233 = vrot.lane.b32.xlu1 %v3532_v8, %s4888_s14  ;;  %1227 = vrot.lane.b32.xlu0 %v3502_v6, %s4888_s14 }
 0x28f   : > { %1225 = vrot.lane.b32.xlu1 %v3500_v1, %s4888_s14  ;;  %1219 = vrot.lane.b32.xlu0 %v3435_v43, %s4888_s14 }
 0x293   : > { %1223 = vrot.lane.b32.xlu1 %v3494_v63, %s4888_s14  ;;  %1217 = vrot.lane.b32.xlu0 %v3437_v44, %s4888_s14 }
 0x297   : > { %1221 = vrot.lane.b32.xlu1 %v3453_v20, %s4888_s14  ;;  %1149 = vrot.lane.b32.xlu0 %v3566_v12, %s3043_s11 }
 0x299   : > { %v3600_v18 = vpop.permute.xlu1 %953  ;;  %v3602_v19 = vpop.permute.xlu0 %955 }
 0x29b   : > { %1151 = vrot.lane.b32.xlu1 %v3576_v15, %s3043_s11  ;;  %1147 = vrot.lane.b32.xlu0 %v3578_v16, %s3043_s11 }
 0x29d   : > { %v3608_v2 = vpop.permute.xlu1 %957  ;;  %v3610_v21 = vpop.permute.xlu0 %999 }
 0x29f   : > { %1189 = vrot.lane.b32.xlu1 %v3532_v8, %s4890_s16  ;;  %1187 = vrot.lane.b32.xlu0 %v3540_v10, %s4890_s16 }
 0x2a1   : > { %v3616_v22 = vpop.permute.xlu1 %997  ;;  %v3618_v23 = vpop.permute.xlu0 %1133 }
 0x2a2   : > { %4891 = vst [vmem:[#allocation13_spill] sm:$0xff] %v3616_v22 }
 0x2a3   : > { %1061 = vrot.lane.b32.xlu1 %v3566_v12, %s3045_s13  ;;  %1063 = vrot.lane.b32.xlu0 %v3576_v15, %s3045_s13 }
 0x2a5   : > { %v3624_v24 = vpop.permute.xlu1 %1001  ;;  %v3626_v25 = vpop.permute.xlu0 %1129 }
 0x2a7   : > { %1059 = vrot.lane.b32.xlu1 %v3578_v16, %s3045_s13  ;;  %1107 = vrot.lane.b32.xlu0 %v3576_v15, %s3042_s10 }
 0x2a9   : > { %v3632_v38 = vpop.permute.xlu1 %1131  ;;  %v3634_v46 = vpop.permute.xlu0 %1045 }
 0x2ab   : > { %1105 = vrot.lane.b32.xlu1 %v3566_v12, %s3042_s10  ;;  %1103 = vrot.lane.b32.xlu0 %v3578_v16, %s3042_s10  ;;  %s4894_s10 = smov 90  }
 0x2ad   : > { %v3640_v26 = vpop.permute.xlu1 %1043  ;;  %v3642_v27 = vpop.permute.xlu0 %1089 }
 0x2af   : > { %1181 = vrot.lane.b32.xlu1 %v3500_v1, %s4890_s16  ;;  %1185 = vrot.lane.b32.xlu0 %v3534_v9, %s4890_s16 }
 0x2b1   : > { %v3648_v28 = vpop.permute.xlu1 %1041  ;;  %v3650_v29 = vpop.permute.xlu0 %1085 }
 0x2b3   : > { %1017 = vrot.lane.b32.xlu1 %v3566_v12, %s3044_s12  ;;  %1019 = vrot.lane.b32.xlu0 %v3576_v15, %s3044_s12 }
 0x2b5   : > { %v3656_v30 = vpop.permute.xlu1 %1087  ;;  %v3658_v31 = vpop.permute.xlu0 %959 }
 0x2b7   : > { %1015 = vrot.lane.b32.xlu1 %v3578_v16, %s3044_s12  ;;  %1239 = vrot.lane.b32.xlu0 %v3576_v15, %s4888_s14 }
 0x2b9   : > { %v3664_v32 = vpop.permute.xlu1 %961  ;;  %v3666_v33 = vpop.permute.xlu0 %963 }
 0x2bb   : > { %1237 = vrot.lane.b32.xlu1 %v3566_v12, %s4888_s14  ;;  %1235 = vrot.lane.b32.xlu0 %v3578_v16, %s4888_s14  ;;  %s3054_s14 = smov 116  }
 0x2bd   : > { %v3675_v14 = vpop.permute.xlu1 %1005  ;;  %v3677_v35 = vpop.permute.xlu0 %1003 }
 0x2bf   : > { %1179 = vrot.lane.b32.xlu1 %v3494_v63, %s4890_s16  ;;  %1183 = vrot.lane.b32.xlu0 %v3502_v6, %s4890_s16 }
 0x2c1   : > { %v3683_v36 = vpop.permute.xlu1 %1139  ;;  %v3685_v37 = vpop.permute.xlu0 %1137 }
 0x2c3   : > { %1177 = vrot.lane.b32.xlu1 %v3453_v20, %s4890_s16  ;;  %1175 = vrot.lane.b32.xlu0 %v3435_v43, %s4890_s16 }
 0x2c5   : > { %v3691_v39 = vpop.permute.xlu1 %1049  ;;  %v3693_v40 = vpop.permute.xlu0 %1135 }
 0x2c7   : > { %1193 = vrot.lane.b32.xlu1 %v3566_v12, %s4890_s16  ;;  %1195 = vrot.lane.b32.xlu0 %v3576_v15, %s4890_s16 }
 0x2c9   : > { %v3699_v41 = vpop.permute.xlu1 %1047  ;;  %v3701_v42 = vpop.permute.xlu0 %1051 }
 0x2cb   : > { %1191 = vrot.lane.b32.xlu1 %v3578_v16, %s4890_s16  ;;  %1173 = vrot.lane.b32.xlu0 %v3437_v44, %s4890_s16  ;;  %s3055_s16 = smov 112  }
 0x2cd   : > { %v3707_v45 = vpop.permute.xlu1 %1093  ;;  %v3709_v17 = vpop.permute.xlu0 %1095 }
 0x2cf   : > { %1277 = vrot.lane.b32.xlu1 %v3532_v8, %s4894_s10  ;;  %1275 = vrot.lane.b32.xlu0 %v3540_v10, %s4894_s10 }
 0x2d1   : > { %v3718_v11 = vpop.permute.xlu1 %1007  ;;  %v3720_v48 = vpop.permute.xlu0 %1091 }
 0x2d3   : > { %1283 = vrot.lane.b32.xlu1 %v3576_v15, %s4894_s10  ;;  %1281 = vrot.lane.b32.xlu0 %v3566_v12, %s4894_s10 }
 0x2d5   : > { %v966_v49 = vpop.permute.xlu1 %965  ;;  %v3726_v50 = vpop.permute.xlu0 %969 }
 0x2d7   : > { %1279 = vrot.lane.b32.xlu1 %v3578_v16, %s4894_s10  ;;  %1273 = vrot.lane.b32.xlu0 %v3534_v9, %s4894_s10 }
 0x2d9   : > { %v968_v51 = vpop.permute.xlu1 %967  ;;  %v3732_v52 = vpop.permute.xlu0 %1145 }
 0x2da   : > { %v982_v8 = vsel %vm282_vm9, %v968_v51, %v3726_v50 }
 0x2db   : > { %1269 = vrot.lane.b32.xlu1 %v3500_v1, %s4894_s10  ;;  %1271 = vrot.lane.b32.xlu0 %v3502_v6, %s4894_s10 }
 0x2dd   : > { %v3738_v53 = vpop.permute.xlu1 %1143  ;;  %v3740_v54 = vpop.permute.xlu0 %1057 }
 0x2df   : > { %1267 = vrot.lane.b32.xlu1 %v3494_v63, %s4894_s10  ;;  %1263 = vrot.lane.b32.xlu0 %v3435_v43, %s4894_s10 }
 0x2e1   : > { %v3746_v55 = vpop.permute.xlu1 %1141  ;;  %v3748_v56 = vpop.permute.xlu0 %1101 }
 0x2e3   : > { %1265 = vrot.lane.b32.xlu1 %v3453_v20, %s4894_s10  ;;  %1261 = vrot.lane.b32.xlu0 %v3437_v44, %s4894_s10  ;;  %s3056_s10 = smov 106  }
 0x2e5   : > { %v3760_v58 = vpop.permute.xlu1 %1055  ;;  %v3762_v59 = vpop.permute.xlu0 %1097 }
 0x2e7   : > { %2418 = vperm.xlu1 %2904, %v2408_v57   ;;  %2423 = vperm.xlu0 %2903, %v2409_v13   ;;  %v2414_v13 = vld [vmem:[%s4857_s4 + $0x30] sm:$0xff] }
 0x2e9   : > { %v3770_v62 = vpop.permute.xlu1 %1053  ;;  %v3772_v7 = vpop.permute.xlu0 %1013 }
 0x2eb   : > { %2428 = vperm.xlu1 %2904, %v2410_v60   ;;  %2433 = vperm.xlu0 %2903, %v2411_v61   ;;  %v2415_v60 = vld [vmem:[%s4857_s4 + $0x38] sm:$0xff] }
 0x2ed   : > { %v3780_v4 = vpop.permute.xlu1 %1099  ;;  %v3782_v57 = vpop.permute.xlu0 %1231 }
 0x2ef   : > { %2438 = vperm.xlu1 %2904, %v2412_v3   ;;  %2443 = vperm.xlu0 %2903, %v2413_v0  }
 0x2f1   : > { %v3790_v61 = vpop.permute.xlu1 %1011  ;;  %v974_v5 = vpop.permute.xlu0 %973 }
 0x2f3   : > { %2448 = vperm.xlu1 %2904, %v2414_v13   ;;  %2453 = vperm.xlu0 %2903, %v2415_v60   ;;  %v981_v60 = vsel %vm282_vm9, %v966_v49, %v968_v51 }
 0x2f5   : > { %v3792_v47 = vpop.permute.xlu1 %1009  ;;  %v3794_v20 = vpop.permute.xlu0 %1229 }
 0x2f9   : > { %v3796_v34 = vpop.permute.xlu1 %975  ;;  %v972_v3 = vpop.permute.xlu0 %971 }
 0x2fa   : > { %v983_v0 = vsel %vm282_vm9, %v972_v3, %v974_v5  ;;  %v984_v6 = vsel %vm282_vm9, %v974_v5, %v3796_v34  ;;  %v980_v3 = vsel %vm282_vm9, %v3664_v32, %v3666_v33 }
 0x2fb   : > { %1442 = vmatprep.subr.bf16.mxu0 %v984_v6  ;;  %v979_v6 = vsel %vm282_vm9, %v3658_v31, %v3664_v32 }
 0x2fc   : > { %1443 = vmatpush1.bf16.msra.mxu0 %v983_v0  ;;  %v977_v0 = vsel %vm282_vm9, %v3600_v18, %v3602_v19 }
 0x2fd   : > { %v3803_v15 = vpop.permute.xlu1 %1233  ;;  %1444 = vmatprep.subr.bf16.mxu0 %v982_v8  ;;  %v3805_v13 = vpop.permute.xlu0 %1227  ;;  %v978_v8 = vsel %vm282_vm9, %v3602_v19, %v3608_v2  ;;  %vm2249_vm9 = vcmask 818176  }
 0x300   : > { %1445 = vmatpush1.bf16.msra.mxu0 %v981_v60 }
 0x301   : > { %v3811_v22 = vpop.permute.xlu1 %1225  ;;  %1446 = vmatprep.subr.bf16.mxu0 %v980_v3  ;;  %v3813_v5 = vpop.permute.xlu0 %1219 }
 0x304   : > { %1447 = vmatpush1.bf16.msra.mxu0 %v979_v6 }
 0x305   : > { %v3821_v49 = vpop.permute.xlu1 %1223  ;;  %1448 = vmatprep.subr.bf16.mxu0 %v978_v8  ;;  %v3823_v51 = vpop.permute.xlu0 %1217 }
 0x308   : > { %1449 = vmatpush1.bf16.msra.mxu0 %v977_v0 }
 0x309   : > { %v3828_v60 = vpop.permute.xlu1 %1221  ;;  %1450 = vmatprep.subr.bf16.mxu0 %v3566_v12  ;;  %v1150_v31 = vpop.permute.xlu0 %1149  ;;  %v1158_v12 = vsel %vm318_vm6, %v3738_v53, %v3732_v52 }
 0x30c   : > { %1451 = vmatpush1.bf16.msra.mxu0 %v3578_v16  ;;  %v1157_v16 = vsel %vm318_vm6, %v3746_v55, %v3738_v53  ;;  %v1154_v53 = vsel %vm318_vm6, %v3632_v38, %v3618_v23 }
 0x30d   : > { %v3832_v32 = vpop.permute.xlu1 %1151  ;;  %1452 = vmatprep.subr.bf16.mxu0 %v3540_v10  ;;  %v1148_v3 = vpop.permute.xlu0 %1147 }
 0x30e   : > { %v1159_v6 = vsel %vm318_vm6, %v1148_v3, %v1150_v31  ;;  %v1160_v8 = vsel %vm318_vm6, %v1150_v31, %v3832_v32 }
 0x30f   : > { %1515 = vmatprep.subr.bf16.mxu1 %v1160_v8 }
 0x310   : > { %1453 = vmatpush1.bf16.msra.mxu0 %v3534_v9  ;;  %1516 = vmatpush1.bf16.msra.mxu1 %v1159_v6  ;;  %v1156_v9 = vsel %vm318_vm6, %v3685_v37, %v3683_v36 }
 0x311   : > { %v3842_v18 = vpop.permute.xlu1 %1189  ;;  %1454 = vmatprep.subr.bf16.mxu0 %v3500_v1  ;;  %1517 = vmatprep.subr.bf16.mxu1 %v1158_v12  ;;  %v3845_v10 = vpop.permute.xlu0 %1187  ;;  %v1155_v1 = vsel %vm318_vm6, %v3693_v40, %v3685_v37  ;;  %v1153_v37 = vsel %vm318_vm6, %v3626_v25, %v3632_v38  ;;  %v1069_v12 = vsel %vm300_vm8, %v3770_v62, %v3760_v58  ;;  %vm2334_vm6 = vcmask 785408  }
 0x312   : > { %v1068_v25 = vsel %vm300_vm8, %v3691_v39, %v3701_v42  ;;  %v1114_v38 = vsel %vm309_vm5, %v3780_v4, %v3748_v56  ;;  %v1113_v62 = vsel %vm309_vm5, %v3762_v59, %v3780_v4  ;;  %v1110_v4 = vsel %vm309_vm5, %v3656_v30, %v3642_v27 }
 0x314   : > { %1455 = vmatpush1.bf16.msra.mxu0 %v3494_v63  ;;  %1518 = vmatpush1.bf16.msra.mxu1 %v1157_v16 }
 0x315   : > { %v1062_v19 = vpop.permute.xlu1 %1061  ;;  %1456 = vmatprep.subr.bf16.mxu0 %v3435_v43  ;;  %1519 = vmatprep.subr.bf16.mxu1 %v1156_v9  ;;  %v3855_v0 = vpop.permute.xlu0 %1063 }
 0x316   : > { %v1072_v63 = vsel %vm300_vm8, %v1062_v19, %v3855_v0 }
 0x318   : > { %1457 = vmatpush1.bf16.msra.mxu0 %v3437_v44  ;;  %1520 = vmatpush1.bf16.msra.mxu1 %v1155_v1  ;;  %v1070_v44 = vsel %vm300_vm8, %v3760_v58, %v3740_v54  ;;  %v1067_v58 = vsel %vm300_vm8, %v3699_v41, %v3691_v39  ;;  %v1112_v1 = vsel %vm309_vm5, %v3707_v45, %v3709_v17 }
 0x319   : > { %v1060_v55 = vpop.permute.xlu1 %1059  ;;  %1458 = vmatprep.subr.bf16.mxu0 %v1072_v63  ;;  %1521 = vmatprep.subr.bf16.mxu1 %v1154_v53  ;;  %v3866_v43 = vpop.permute.xlu0 %1107  ;;  %v1065_v39 = vsel %vm300_vm8, %v3648_v28, %v3640_v26  ;;  %v1111_v41 = vsel %vm309_vm5, %v3720_v48, %v3707_v45  ;;  %v1109_v28 = vsel %vm309_vm5, %v3650_v29, %v3656_v30 }
 0x31a   : > { %v1071_v31 = vsel %vm300_vm8, %v1060_v55, %v1062_v19  ;;  %v1066_v19 = vsel %vm300_vm8, %v3640_v26, %v3634_v46  ;;  %v1026_v45 = vsel %vm291_vm7, %v3790_v61, %v3772_v7  ;;  %v1024_v29 = vsel %vm291_vm7, %v3675_v14, %v3718_v11 }
 0x31b   : > { %v1246_v30 = vsel %vm336_vm4, %v3782_v57, %v3803_v15  ;;  %vm2343_vm8 = vcmask 916480  }
 0x31c   : > { %1459 = vmatpush2.bf16.msra.mxu0 %v1071_v31  ;;  %1522 = vmatpush1.bf16.msra.mxu1 %v1153_v37 }
 0x31d   : > { %v1106_v40 = vpop.permute.xlu1 %1105  ;;  %1460 = vmatprep.subr.bf16.mxu0 %v1070_v44  ;;  %v1104_v3 = vpop.permute.xlu0 %1103 }
 0x31e   : > { %v1115_v6 = vsel %vm309_vm5, %v1104_v3, %v1106_v40  ;;  %v1116_v8 = vsel %vm309_vm5, %v1106_v40, %v3866_v43  ;;  %v1025_v3 = vsel %vm291_vm7, %v3792_v47, %v3790_v61  ;;  %v1023_v47 = vsel %vm291_vm7, %v3677_v35, %v3675_v14  ;;  %v4895_v14 = vld [vmem:[#allocation13_spill] sm:$0xff] }
 0x31f   : > { %1523 = vmatprep.subr.bf16.mxu1 %v1116_v8  ;;  %v1245_v61 = vsel %vm336_vm4, %v3794_v20, %v3782_v57  ;;  %v1021_v35 = vsel %vm291_vm7, %v4895_v14, %v3610_v21  ;;  %v1243_v20 = vsel %vm336_vm4, %v3821_v49, %v3811_v22  ;;  %v3959_v57 = vld [vmem:[#allocation3] ss:$20 sps:$4 sm:$0xff]   ;;  %vm2325_vm5 = vcmask 654336  }
 0x320   : > { %1461 = vmatpush2.bf16.msra.mxu0 %v1069_v12  ;;  %1524 = vmatpush1.bf16.msra.mxu1 %v1115_v6  ;;  %v1022_v12 = vsel %vm291_vm7, %v3610_v21, %v3624_v24  ;;  %v1241_v21 = vsel %vm336_vm4, %v3823_v51, %v3813_v5  ;;  %v3981_v51 = vld [vmem:[#allocation3 + $0x54] ss:$20 sps:$4 sm:$0xff]  }
 0x321   : > { %v3887_v16 = vpop.permute.xlu1 %1181  ;;  %1462 = vmatprep.subr.bf16.mxu0 %v1068_v25  ;;  %1525 = vmatprep.subr.bf16.mxu1 %v1114_v38  ;;  %v3889_v9 = vpop.permute.xlu0 %1185  ;;  %v1244_v25 = vsel %vm336_vm4, %v3811_v22, %v3805_v13 }
 0x324   : > { %1463 = vmatpush2.bf16.msra.mxu0 %v1067_v58  ;;  %1526 = vmatpush1.bf16.msra.mxu1 %v1113_v62  ;;  %v1242_v62 = vsel %vm336_vm4, %v3813_v5, %v3828_v60  ;;  %v1202_v5 = vsel %vm327_vm3, %v3845_v10, %v3842_v18 }
 0x325   : > { %v1018_v63 = vpop.permute.xlu1 %1017  ;;  %1464 = vmatprep.subr.bf16.mxu0 %v1066_v19  ;;  %1527 = vmatprep.subr.bf16.mxu1 %v1112_v1  ;;  %v3903_v53 = vpop.permute.xlu0 %1019  ;;  %v3964_v19 = vld [vmem:[#allocation3 + $0x2c] ss:$20 sps:$4 sm:$0xff]  }
 0x326   : > { %v1028_v59 = vsel %vm291_vm7, %v1018_v63, %v3903_v53 }
 0x328   : > { %1465 = vmatpush2.bf16.msra.mxu0 %v1065_v39  ;;  %1528 = vmatpush1.bf16.msra.mxu1 %v1111_v41 }
 0x329   : > { %v1016_v55 = vpop.permute.xlu1 %1015  ;;  %1466 = vmatprep.subr.bf16.mxu0 %v1028_v59  ;;  %1529 = vmatprep.subr.bf16.mxu1 %v1110_v4  ;;  %v3916_v31 = vpop.permute.xlu0 %1239  ;;  %v3976_v59 = vld [vmem:[#allocation3 + $0x28] ss:$20 sps:$4 sm:$0xff]  }
 0x32a   : > { %v1027_v26 = vsel %vm291_vm7, %v1016_v55, %v1018_v63  ;;  %vm2048_vm7 = vcmask 932864  }
 0x32c   : > { %1467 = vmatpush2.bf16.msra.mxu0 %v1027_v26  ;;  %1530 = vmatpush1.bf16.msra.mxu1 %v1109_v28  ;;  %v1201_v26 = vsel %vm327_vm3, %v3889_v9, %v3845_v10  ;;  %v3999_v10 = vld [vmem:[#allocation3 + $0x50] ss:$20 sps:$4 sm:$0xff]  }
 0x32d   : > { %v1238_v48 = vpop.permute.xlu1 %1237  ;;  %1468 = vmatprep.subr.bf16.mxu0 %v1026_v45  ;;  %v1236_v37 = vpop.permute.xlu0 %1235 }
 0x32e   : > { %v1247_v44 = vsel %vm336_vm4, %v1236_v37, %v1238_v48  ;;  %v1248_v40 = vsel %vm336_vm4, %v1238_v48, %v3916_v31  ;;  %vm2308_vm4 = vcmask 392192  }
 0x32f   : > { %1531 = vmatprep.subr.bf16.mxu1 %v1248_v40 }
 0x330   : > { %1469 = vmatpush2.bf16.msra.mxu0 %v1025_v3  ;;  %1532 = vmatpush2.bf16.msra.mxu1 %v1247_v44 }
 0x331   : > { %v1180_v6 = vpop.permute.xlu1 %1179  ;;  %1470 = vmatprep.subr.bf16.mxu0 %v1024_v29  ;;  %1533 = vmatprep.subr.bf16.mxu1 %v1246_v30  ;;  %v3937_v8 = vpop.permute.xlu0 %1183  ;;  %v4004_v30 = vld [vmem:[#allocation3 + $0x7c] ss:$20 sps:$4 sm:$0xff]  }
 0x332   : > { %v1200_v28 = vsel %vm327_vm3, %v3887_v16, %v3937_v8  ;;  %v1199_v44 = vsel %vm327_vm3, %v1180_v6, %v3887_v16 }
 0x334   : > { %1471 = vmatpush2.bf16.msra.mxu0 %v1023_v47  ;;  %1534 = vmatpush2.bf16.msra.mxu1 %v1245_v61  ;;  %v4008_v61 = vld [vmem:[#allocation3 + $0x8] ss:$20 sps:$4 sm:$0xff]  }
 0x335   : > { %v3951_v38 = vpop.permute.xlu1 %1177  ;;  %1472 = vmatprep.subr.bf16.mxu0 %v1022_v12  ;;  %1535 = vmatprep.subr.bf16.mxu1 %v1244_v25  ;;  %v1176_v58 = vpop.permute.xlu0 %1175 }
 0x336   : > { %v1198_v9 = vsel %vm327_vm3, %v1176_v58, %v3951_v38 }
 0x338   : > { %1473 = vmatpush2.bf16.msra.mxu0 %v1021_v35  ;;  %1536 = vmatpush2.bf16.msra.mxu1 %v1243_v20  ;;  %v4022_v35 = vld [vmem:[#allocation3 + $0x78] ss:$20 sps:$4 sm:$0xff]  }
 0x339   : > { %v1194_v1 = vpop.permute.xlu1 %1193  ;;  %1537 = vmatprep.subr.bf16.mxu1 %v1242_v62  ;;  %v3966_v63 = vpop.permute.xlu0 %1195 }
 0x33a   : > { %v1204_v22 = vsel %vm327_vm3, %v1194_v1, %v3966_v63 }
 0x33b   : > { %1475 = vmatmul.mubr.bf16.vlgmr.msra.gmra.mxu0 %v3959_v57 }
 0x33c   : > { %1538 = vmatpush2.bf16.msra.mxu1 %v1241_v21  ;;  %1484 = vmatprep.mubr.bf16.mxu0 %v3964_v19 }
 0x33d   : > { %v1192_v49 = vpop.permute.xlu1 %1191  ;;  %1539 = vmatprep.subr.bf16.mxu1 %v1204_v22  ;;  %v1174_v39 = vpop.permute.xlu0 %1173  ;;  %v4896_v22 = vmov 0  }
 0x33e   : > { %v1203_v41 = vsel %vm327_vm3, %v1192_v49, %v1194_v1  ;;  %v1197_v47 = vsel %vm327_vm3, %v1174_v39, %v1176_v58  ;;  %v4018_v58 = vld [vmem:[#allocation3 + $0x34] ss:$20 sps:$4 sm:$0xff]   ;;  %v4029_v1 = vld [vmem:[#allocation3 + $0x30] ss:$20 sps:$4 sm:$0xff]   ;;  %vm2299_vm3 = vcmask 261120  }
 0x33f   : > { %v4039_v39 = vld [vmem:[#allocation3 + $0x5c] ss:$20 sps:$4 sm:$0xff]  }
 0x340   : > { %1540 = vmatpush2.bf16.msra.mxu1 %v1203_v41  ;;  %v4042_v41 = vld [vmem:[#allocation3 + $0x10] ss:$20 sps:$4 sm:$0xff]  }
 0x341   : > { %v3983_v4 = vpop.permute.xlu1 %1277  ;;  %1541 = vmatprep.subr.bf16.mxu1 %v1202_v5  ;;  %v1276_v55 = vpop.permute.xlu0 %1275 }
 0x342   : > { %v1290_v16 = vsel %vm345_vm2, %v1276_v55, %v3983_v4 }
 0x343   : > { %1485 = vmatmul.mubr.bf16.gmra.mxu0 %v3976_v59 }
 0x344   : > { %1542 = vmatpush2.bf16.msra.mxu1 %v1201_v26  ;;  %1494 = vmatprep.mubr.bf16.mxu0 %v3981_v51 }
 0x345   : > { %v3993_v45 = vpop.permute.xlu1 %1283  ;;  %1543 = vmatprep.subr.bf16.mxu1 %v1200_v28  ;;  %v1282_v48 = vpop.permute.xlu0 %1281 }
 0x346   : > { %v1292_v37 = vsel %vm345_vm2, %v1282_v48, %v3993_v45 }
 0x347   : > { %1596 = vmatprep.subr.bf16.mxu0 %v1292_v37 }
 0x348   : > { %1544 = vmatpush2.bf16.msra.mxu1 %v1199_v44 }
 0x349   : > { %v1280_v40 = vpop.permute.xlu1 %1279  ;;  %1545 = vmatprep.subr.bf16.mxu1 %v1198_v9  ;;  %v1274_v3 = vpop.permute.xlu0 %1273 }
 0x34a   : > { %v1291_v29 = vsel %vm345_vm2, %v1280_v40, %v1282_v48  ;;  %v1289_v14 = vsel %vm345_vm2, %v1274_v3, %v1276_v55 }
 0x34b   : > { %1495 = vmatmul.mubr.bf16.gmra.mxu0 %v3999_v10 }
 0x34c   : > { %1597 = vmatpush1.bf16.msra.mxu0 %v1291_v29  ;;  %1546 = vmatpush2.bf16.msra.mxu1 %v1197_v47 }
 0x34d   : > { %1598 = vmatprep.subr.bf16.mxu0 %v1290_v16  ;;  %v1270_v6 = vpop.permute.xlu1 %1269  ;;  %2703 = vmatprep.subr.bf16.mxu1 %v3855_v0  ;;  %v4013_v12 = vpop.permute.xlu0 %1271 }
 0x34e   : > { %v1288_v25 = vsel %vm345_vm2, %v1270_v6, %v4013_v12  ;;  %1504 = vmatprep.mubr.bf16.mxu0 %v4004_v30 }
 0x34f   : > { %1548 = vmatmul.mubr.bf16.vlgmr.msra.gmra.mxu1 %v4008_v61 }
 0x350   : > { %1599 = vmatpush1.bf16.msra.mxu0 %v1289_v14  ;;  %2704 = vmatpush3.bf16.msra.mxu1 %v3796_v34 }
 0x351   : > { %1600 = vmatprep.subr.bf16.mxu0 %v1288_v25  ;;  %v1268_v0 = vpop.permute.xlu1 %1267  ;;  %2705 = vmatprep.subr.bf16.mxu1 %v3740_v54  ;;  %v1264_v20 = vpop.permute.xlu0 %1263 }
 0x352   : > { %v1287_v62 = vsel %vm345_vm2, %v1268_v0, %v1270_v6  ;;  %1557 = vmatprep.mubr.bf16.mxu1 %v4018_v58 }
 0x353   : > { %1505 = vmatmul.mubr.bf16.gmra.mxu0 %v4022_v35 }
 0x354   : > { %1601 = vmatpush1.bf16.msra.mxu0 %v1287_v62  ;;  %2706 = vmatpush3.bf16.msra.mxu1 %v3726_v50  ;;  %v4897_v50 = vld [vmem:[#allocation12_spill] sm:$0xff] }
 0x355   : > { %v4032_v21 = vpop.permute.xlu1 %1265  ;;  %2707 = vmatprep.subr.bf16.mxu1 %v3701_v42  ;;  %v1262_v34 = vpop.permute.xlu0 %1261  ;;  %1620 = vmatprep.mubr.bf16.mxu0 %v4896_v22  ;;  %v2937_v42 = vld [vmem:[#allocation3 + $0x58] ss:$20 sps:$4 sm:$0xff]  }
 0x356   : > { %v1285_v54 = vsel %vm345_vm2, %v1262_v34, %v1264_v20  ;;  %v1286_v49 = vsel %vm345_vm2, %v1264_v20, %v4032_v21  ;;  %vm2290_vm2 = vcmask 130048  }
 0x357   : > { %1558 = vmatmul.mubr.bf16.gmra.mxu1 %v4029_v1  ;;  %1602 = vmatprep.subr.bf16.mxu0 %v1286_v49 }
 0x358   : > { %1603 = vmatpush1.bf16.msra.mxu0 %v1285_v54  ;;  %2708 = vmatpush3.bf16.msra.mxu1 %v3666_v33  ;;  %v2939_v33 = vld [vmem:[#allocation3 + $0x84] ss:$20 sps:$4 sm:$0xff]  }
 0x359   : > { %2709 = vmatprep.subr.bf16.mxu1 %v3634_v46  ;;  %2743 = vmatprep.subr.bf16.mxu0 %v3916_v31  ;;  %v2938_v46 = vld [vmem:[#allocation3 + $0x38] ss:$20 sps:$4 sm:$0xff]  }
 0x35a   : > { %1567 = vmatprep.mubr.bf16.mxu1 %v4039_v39 }
 0x35b   : > { %2664 = vmatmul.mubr.msk.bf16.vlgmr.msra.gmra.mxu0 %vm1429_vm1, %v4042_v41 }
 0x35c   : > { %2710 = vmatpush3.bf16.msra.mxu1 %v3608_v2  ;;  %2744 = vmatpush3.bf16.msra.mxu0 %v3832_v32  ;;  %v2941_v2 = vld [vmem:[#allocation3 + $0x80] ss:$20 sps:$4 sm:$0xff]  }
 0x35d   : > { %2711 = vmatprep.subr.bf16.mxu1 %v3903_v53  ;;  %2745 = vmatprep.subr.bf16.mxu0 %v3803_v15  ;;  %v4898_v32 = vld [vmem:[#allocation11_spill] sm:$0xff] }
 0x35e   : > { %1630 = vmatprep.mubr.bf16.mxu0 %v4896_v22  ;;  %v2942_v15 = vld [vmem:[#allocation3 + $0x60] ss:$20 sps:$4 sm:$0xff]  }
 0x35f   : > { %1568 = vmatmul.mubr.bf16.gmra.mxu1 %v2937_v42 }
 0x360   : > { %2712 = vmatpush3.bf16.msra.mxu1 %v4897_v50  ;;  %2746 = vmatpush3.bf16.msra.mxu0 %v3732_v52  ;;  %v4899_v52 = vld [vmem:[#allocation10_spill] sm:$0xff] }
 0x361   : > { %2713 = vmatprep.subr.bf16.mxu1 %v3772_v7  ;;  %2747 = vmatprep.subr.bf16.mxu0 %v3805_v13  ;;  %v4900_v7 = vld [vmem:[#allocation14_spill] sm:$0xff] }
 0x362   : > { %1577 = vmatprep.mubr.bf16.mxu1 %v2939_v33  ;;  %v4215_v54 = vpop.permute.xlu1 %2418  ;;  %v4218_v49 = vpop.permute.xlu0 %2423 }
 0x363   : > { %2665 = vmatmul.mubr.msk.bf16.gmra.mxu0 %vm1429_vm1, %v2938_v46  ;;  %4903 = vst [vmem:[#allocation13_spill] sm:$0xff] %v4215_v54 }
 0x364   : > { %2714 = vmatpush3.bf16.msra.mxu1 %v4898_v32  ;;  %2748 = vmatpush3.bf16.msra.mxu0 %v3683_v36  ;;  %v4901_v36 = vld [vmem:[#allocation9_spill] sm:$0xff] }
 0x365   : > { %2715 = vmatprep.subr.bf16.mxu1 %v3718_v11  ;;  %2749 = vmatprep.subr.bf16.mxu0 %v3828_v60 }
 0x366   : > { %1640 = vmatprep.mubr.bf16.mxu0 %v4896_v22 }
 0x367   : > { %1578 = vmatmul.mubr.bf16.gmra.mxu1 %v2941_v2 }
 0x368   : > { %2716 = vmatpush3.bf16.msra.mxu1 %v4899_v52  ;;  %2750 = vmatpush3.bf16.msra.mxu0 %v3618_v23  ;;  %v2943_v23 = vld [vmem:[#allocation3 + $0x88] ss:$20 sps:$4 sm:$0xff]  }
 0x369   : > { %2717 = vmatprep.subr.bf16.mxu1 %v3624_v24  ;;  %2751 = vmatprep.subr.bf16.mxu0 %v3966_v63  ;;  %v4902_v24 = vld [vmem:[#allocation15_spill] sm:$0xff] }
 0x36a   : > { %1693 = vmatprep.mubr.bf16.mxu1 %v4900_v7 }
 0x36b   : > { %2666 = vmatmul.mubr.msk.bf16.gmra.mxu0 %vm1429_vm1, %v2942_v15 }
 0x36c   : > { %2718 = vmatpush3.bf16.msra.mxu1 %v4901_v36  ;;  %2752 = vmatpush3.bf16.msra.mxu0 %v3866_v43 }
 0x36d   : > { %2753 = vmatprep.subr.bf16.mxu0 %v3842_v18  ;;  %2809 = vmatprep.subr.bf16.mxu1 %v3993_v45 }
 0x36e   : > { %1650 = vmatprep.mubr.bf16.mxu0 %v4896_v22 }
 0x36f   : > { %1694 = vmatmul.mubr.bf16.vlgmr.msra.gmra.mxu1 %v3959_v57 }
 0x370   : > { %2754 = vmatpush3.bf16.msra.mxu0 %v3748_v56  ;;  %2810 = vmatpush3.bf16.msra.mxu1 %v3993_v45 }
 0x371   : > { %2755 = vmatprep.subr.bf16.mxu0 %v3937_v8  ;;  %2811 = vmatprep.subr.bf16.mxu1 %v3983_v4 }
 0x372   : > { %1701 = vmatprep.mubr.bf16.mxu1 %v3964_v19 }
 0x373   : > { %2667 = vmatmul.mubr.msk.bf16.gmra.mxu0 %vm1429_vm1, %v2943_v23 }
 0x374   : > { %2756 = vmatpush3.bf16.msra.mxu0 %v3709_v17  ;;  %2812 = vmatpush3.bf16.msra.mxu1 %v3983_v4 }
 0x375   : > { %2757 = vmatprep.subr.bf16.mxu0 %v3951_v38  ;;  %2813 = vmatprep.subr.bf16.mxu1 %v4013_v12 }
 0x376   : > { %1758 = vmatprep.mubr.bf16.mxu0 %v4902_v24 }
 0x377   : > { %1702 = vmatmul.mubr.bf16.gmra.mxu1 %v3976_v59 }
 0x378   : > { %2758 = vmatpush3.bf16.msra.mxu0 %v3642_v27  ;;  %2814 = vmatpush3.bf16.msra.mxu1 %v4013_v12 }
 0x379   : > { %2815 = vmatprep.subr.bf16.mxu1 %v4032_v21  ;;  %1709 = vmatprep.mubr.bf16.mxu1 %v3981_v51 }
 0x37b   : > { %1759 = vmatmul.mubr.bf16.vlgmr.msra.gmra.mxu0 %v4008_v61 }
 0x37c   : > { %2816 = vmatpush3.bf16.msra.mxu1 %v4032_v21  ;;  %1766 = vmatprep.mubr.bf16.mxu0 %v4018_v58 }
 0x37f   : > { %1710 = vmatmul.mubr.bf16.gmra.mxu1 %v3999_v10 }
 0x380   : > { %1717 = vmatprep.mubr.bf16.mxu1 %v4004_v30 }
 0x383   : > { %1767 = vmatmul.mubr.bf16.gmra.mxu0 %v4029_v1 }
 0x384   : > { %1774 = vmatprep.mubr.bf16.mxu0 %v4039_v39  ;;  %v4222_v39 = vpop.permute.xlu1 %2428 }
 0x385   : > { %4904 = vst [vmem:[#allocation12_spill] sm:$0xff] %v4222_v39 }
 0x387   : > { %1718 = vmatmul.mubr.bf16.gmra.mxu1 %v4022_v35 }
 0x388   : > { %2817 = vmatprep.mubr.msk.bf16.mxu1 %vm1429_vm1, %v4042_v41  ;;  %v4225_v41 = vpop.permute.xlu0 %2433 }
 0x38b   : > { %1775 = vmatmul.mubr.bf16.gmra.mxu0 %v2937_v42 }
 0x38c   : > { %1782 = vmatprep.mubr.bf16.mxu0 %v2939_v33  ;;  %v4229_v33 = vpop.permute.xlu1 %2438  ;;  %v4232_v50 = vpop.permute.xlu0 %2443 }
 0x38f   : > { %2818 = vmatmul.mubr.msk.bf16.vlgmr.msra.gmra.mxu1 %vm1429_vm1, %v2938_v46 }
 0x390   : > { %2821 = vmatprep.mubr.msk.bf16.mxu1 %vm1429_vm1, %v2942_v15  ;;  %v4236_v15 = vpop.permute.xlu1 %2448  ;;  %v4240_v36 = vpop.permute.xlu0 %2453 }
 0x391   : > { %4905 = vst [vmem:[#allocation11_spill] sm:$0xff] %v4240_v36 }
 0x393   : > { %1783 = vmatmul.mubr.bf16.gmra.mxu0 %v2941_v2 }
 0x397   : > { %2822 = vmatmul.mubr.msk.bf16.gmra.mxu1 %vm1429_vm1, %v2943_v23 }
 0x3fb   : > { %v1476_v27 = vpop.f32.mrf.mxu0 }
 0x3fd   : > { %v1478_v17 = vpop.f32.mrf.mxu0 }
 0x3ff   : > { %v1480_v11 = vpop.f32.mrf.mxu0 }
 0x401   : > { %v1482_v56 = vpop.f32.mrf.mxu0 }
 0x403   : > { %v4106_v13 = vpop.f32.mrf.mxu0 }
 0x405   : > { %v4108_v60 = vpop.f32.mrf.mxu0 }
 0x407   : > { %v4110_v18 = vpop.f32.mrf.mxu0 }
 0x409   : > { %v4112_v43 = vpop.f32.mrf.mxu0 }
 0x40b   : > { %v4114_v53 = vpop.f32.mrf.mxu0 }
 0x40d   : > { %v4116_v31 = vpop.f32.mrf.mxu0 }
 0x40f   : > { %v4118_v8 = vpop.f32.mrf.mxu0  ;;  %v1549_v19 = vpop.f32.mrf.mxu1 }
 0x410   : > { %v1550_v4 = vadd.f32 %v1549_v19, %v1476_v27 }
 0x411   : > { %v4120_v38 = vpop.f32.mrf.mxu0  ;;  %v1551_v5 = vpop.f32.mrf.mxu1 }
 0x412   : > { %v1552_v26 = vadd.f32 %v1551_v5, %v1478_v17 }
 0x413   : > { %v4122_v57 = vpop.f32.mrf.mxu0  ;;  %v1553_v45 = vpop.f32.mrf.mxu1 }
 0x414   : > { %v1554_v10 = vadd.f32 %v1553_v45, %v1480_v11 }
 0x415   : > { %v4124_v63 = vpop.f32.mrf.mxu0  ;;  %v1555_v40 = vpop.f32.mrf.mxu1 }
 0x416   : > { %v1556_v29 = vadd.f32 %v1555_v40, %v1482_v56 }
 0x417   : > { %v4126_v59 = vpop.f32.mrf.mxu0  ;;  %v1559_v47 = vpop.f32.mrf.mxu1 }
 0x418   : > { %v1560_v0 = vadd.f32 %v1559_v47, %v4106_v13 }
 0x419   : > { %v4128_v51 = vpop.f32.mrf.mxu0  ;;  %v1561_v16 = vpop.f32.mrf.mxu1 }
 0x41a   : > { %v1562_v12 = vadd.f32 %v1561_v16, %v4108_v60 }
 0x41b   : > { %v1622_v55 = vpop.f32.mrf.mxu0  ;;  %v1563_v25 = vpop.f32.mrf.mxu1 }
 0x41c   : > { %v4130_v28 = vadd.f32 %v1622_v55, %v1550_v4  ;;  %v1564_v35 = vadd.f32 %v1563_v25, %v4110_v18 }
 0x41d   : > { %v1624_v48 = vpop.f32.mrf.mxu0  ;;  %v1565_v1 = vpop.f32.mrf.mxu1 }
 0x41e   : > { %v1625_v37 = vadd.f32 %v1624_v48, %v1552_v26  ;;  %1864 = vrot.lane.b32.xlu1 %v4130_v28, %s3044_s12  ;;  %v1566_v34 = vadd.f32 %v1565_v1, %v4112_v43 }
 0x41f   : > { %v1626_v44 = vpop.f32.mrf.mxu0  ;;  %v1569_v42 = vpop.f32.mrf.mxu1 }
 0x420   : > { %2018 = vrot.lane.b32.xlu0 %v1625_v37, %s3049_s17  ;;  %v4135_v9 = vadd.f32 %v1626_v44, %v1554_v10  ;;  %v1570_v43 = vadd.f32 %v1569_v42, %v4114_v53 }
 0x421   : > { %v1628_v3 = vpop.f32.mrf.mxu0  ;;  %v1571_v2 = vpop.f32.mrf.mxu1 }
 0x422   : > { %1888 = vrot.lane.b32.xlu1 %v4130_v28, %s3050_s18  ;;  %v1629_v30 = vadd.f32 %v1628_v3, %v1556_v29  ;;  %v1572_v52 = vadd.f32 %v1571_v2, %v4116_v31 }
 0x423   : > { %v1632_v61 = vpop.f32.mrf.mxu0  ;;  %v1573_v7 = vpop.f32.mrf.mxu1 }
 0x424   : > { %1866 = vrot.lane.b32.xlu0 %v4135_v9, %s3044_s12  ;;  %v4184_v62 = vadd.f32 %v1632_v61, %v1560_v0  ;;  %v1574_v27 = vadd.f32 %v1573_v7, %v4118_v8 }
 0x425   : > { %v1634_v6 = vpop.f32.mrf.mxu0  ;;  %v1575_v53 = vpop.f32.mrf.mxu1 }
 0x426   : > { %1912 = vrot.lane.b32.xlu1 %v4130_v28, %s4874_s19  ;;  %v1635_v58 = vadd.f32 %v1634_v6, %v1562_v12  ;;  %v1576_v3 = vadd.f32 %v1575_v53, %v4120_v38 }
 0x427   : > { %v1636_v14 = vpop.f32.mrf.mxu0  ;;  %v4281_v48 = vpop.f32.mrf.mxu1 }
 0x428   : > { %1890 = vrot.lane.b32.xlu0 %v4135_v9, %s3050_s18  ;;  %v4181_v20 = vadd.f32 %v1636_v14, %v1564_v35 }
 0x429   : > { %v1638_v21 = vpop.f32.mrf.mxu0  ;;  %v1581_v47 = vpop.f32.mrf.mxu1 }
 0x42a   : > { %1936 = vrot.lane.b32.xlu1 %v4130_v28, %s3052_s20  ;;  %v1639_v22 = vadd.f32 %v1638_v21, %v1566_v34 }
 0x42b   : > { %v1642_v46 = vpop.f32.mrf.mxu0  ;;  %v1583_v14 = vpop.f32.mrf.mxu1 }
 0x42c   : > { %1914 = vrot.lane.b32.xlu0 %v4135_v9, %s4874_s19  ;;  %v4263_v8 = vadd.f32 %v1642_v46, %v1570_v43 }
 0x42d   : > { %v1644_v32 = vpop.f32.mrf.mxu0  ;;  %v4318_v21 = vpop.f32.mrf.mxu1 }
 0x42e   : > { %1960 = vrot.lane.b32.xlu1 %v4130_v28, %s3053_s26  ;;  %v4242_v23 = vadd.f32 %v1644_v32, %v1572_v52 }
 0x42f   : > { %v1646_v24 = vpop.f32.mrf.mxu0 }
 0x430   : > { %1938 = vrot.lane.b32.xlu0 %v4135_v9, %s3052_s20  ;;  %v4248_v11 = vadd.f32 %v1646_v24, %v1574_v27 }
 0x432   : > { %1984 = vrot.lane.b32.xlu1 %v4130_v28, %s3054_s14 }
 0x434   : > { %1962 = vrot.lane.b32.xlu0 %v4135_v9, %s3053_s26 }
 0x436   : > { %2016 = vrot.lane.b32.xlu1 %v4130_v28, %s3049_s17 }
 0x438   : > { %1986 = vrot.lane.b32.xlu0 %v4135_v9, %s3054_s14 }
 0x43a   : > { %2065 = vrot.lane.b32.xlu1 %v1625_v37, %s3055_s16 }
 0x43c   : > { %2022 = vrot.lane.b32.xlu0 %v1629_v30, %s3049_s17 }
 0x43e   : > { %2089 = vrot.lane.b32.xlu1 %v1625_v37, %s3045_s13 }
 0x440   : > { %2067 = vrot.lane.b32.xlu0 %v1629_v30, %s3055_s16 }
 0x442   : > { %2113 = vrot.lane.b32.xlu1 %v1625_v37, %s3043_s11 }
 0x444   : > { %2091 = vrot.lane.b32.xlu0 %v1629_v30, %s3045_s13 }
 0x446   : > { %2137 = vrot.lane.b32.xlu1 %v1625_v37, %s3056_s10 }
 0x448   : > { %2115 = vrot.lane.b32.xlu0 %v1629_v30, %s3043_s11 }
 0x44a   : > { %2161 = vrot.lane.b32.xlu1 %v1625_v37, %s3057_s28 }
 0x44c   : > { %2139 = vrot.lane.b32.xlu0 %v1629_v30, %s3056_s10 }
 0x44e   : > { %2185 = vrot.lane.b32.xlu1 %v1625_v37, %s3058_s29 }
 0x450   : > { %2163 = vrot.lane.b32.xlu0 %v1629_v30, %s3057_s28 }
 0x452   : > { %2217 = vrot.lane.b32.xlu1 %v1625_v37, %s3059_s9 }
 0x454   : > { %2187 = vrot.lane.b32.xlu0 %v1629_v30, %s3058_s29 }
 0x456   : > { %2020 = vrot.lane.b32.xlu1 %v4135_v9, %s3049_s17 }
 0x458   : > { %2026 = vrot.lane.b32.xlu0 %v1635_v58, %s3049_s17 }
 0x45a   : > { %2221 = vrot.lane.b32.xlu1 %v1629_v30, %s3059_s9 }
 0x45c   : > { %1870 = vrot.lane.b32.xlu0 %v4181_v20, %s3044_s12 }
 0x45e   : > { %1868 = vrot.lane.b32.xlu1 %v4184_v62, %s3044_s12 }
 0x460   : > { %1894 = vrot.lane.b32.xlu0 %v4181_v20, %s3050_s18 }
 0x462   : > { %1892 = vrot.lane.b32.xlu1 %v4184_v62, %s3050_s18 }
 0x464   : > { %1918 = vrot.lane.b32.xlu0 %v4181_v20, %s4874_s19 }
 0x466   : > { %1916 = vrot.lane.b32.xlu1 %v4184_v62, %s4874_s19 }
 0x468   : > { %1942 = vrot.lane.b32.xlu0 %v4181_v20, %s3052_s20 }
 0x46a   : > { %1940 = vrot.lane.b32.xlu1 %v4184_v62, %s3052_s20 }
 0x46c   : > { %1966 = vrot.lane.b32.xlu0 %v4181_v20, %s3053_s26 }
 0x46e   : > { %1964 = vrot.lane.b32.xlu1 %v4184_v62, %s3053_s26 }
 0x470   : > { %1990 = vrot.lane.b32.xlu0 %v4181_v20, %s3054_s14 }
 0x472   : > { %1988 = vrot.lane.b32.xlu1 %v4184_v62, %s3054_s14 }
 0x474   : > { %2030 = vrot.lane.b32.xlu0 %v1639_v22, %s3049_s17 }
 0x476   : > { %2024 = vrot.lane.b32.xlu1 %v4184_v62, %s3049_s17 }
 0x478   : > { %2071 = vrot.lane.b32.xlu0 %v1639_v22, %s3055_s16 }
 0x47a   : > { %2069 = vrot.lane.b32.xlu1 %v1635_v58, %s3055_s16 }
 0x47c   : > { %2095 = vrot.lane.b32.xlu0 %v1639_v22, %s3045_s13 }
 0x47e   : > { %2093 = vrot.lane.b32.xlu1 %v1635_v58, %s3045_s13 }
 0x480   : > { %2119 = vrot.lane.b32.xlu0 %v1639_v22, %s3043_s11 }
 0x482   : > { %2117 = vrot.lane.b32.xlu1 %v1635_v58, %s3043_s11 }
 0x484   : > { %2143 = vrot.lane.b32.xlu0 %v1639_v22, %s3056_s10 }
 0x486   : > { %2141 = vrot.lane.b32.xlu1 %v1635_v58, %s3056_s10 }
 0x488   : > { %2167 = vrot.lane.b32.xlu0 %v1639_v22, %s3057_s28 }
 0x48a   : > { %2165 = vrot.lane.b32.xlu1 %v1635_v58, %s3057_s28 }
 0x48c   : > { %2191 = vrot.lane.b32.xlu0 %v1639_v22, %s3058_s29 }
 0x48e   : > { %2189 = vrot.lane.b32.xlu1 %v1635_v58, %s3058_s29 }
 0x490   : > { %2034 = vrot.lane.b32.xlu0 %v4242_v23, %s3049_s17  ;;  %v1865_v17 = vpop.permute.xlu1 %1864 }
 0x491   : > { %v2291_v26 = vsel %vm2290_vm2, %v4130_v28, %v1865_v17  ;;  %v1648_v28 = vpop.f32.mrf.mxu0 }
 0x492   : > { %2225 = vrot.lane.b32.xlu1 %v1635_v58, %s3059_s9  ;;  %v2019_v56 = vpop.permute.xlu0 %2018  ;;  %v4299_v6 = vadd.f32 %v1648_v28, %v1576_v3 }
 0x493   : > { %v1652_v17 = vpop.f32.mrf.mxu0 }
 0x494   : > { %1874 = vrot.lane.b32.xlu0 %v4248_v11, %s3044_s12  ;;  %v1889_v13 = vpop.permute.xlu1 %1888 }
 0x495   : > { %v2300_v37 = vsel %vm2299_vm3, %v2291_v26, %v1889_v13  ;;  %v1654_v43 = vpop.f32.mrf.mxu0 }
 0x496   : > { %2028 = vrot.lane.b32.xlu1 %v4181_v20, %s3049_s17  ;;  %v4255_v60 = vpop.permute.xlu0 %1866 }
 0x497   : > { %v2292_v53 = vsel %vm2290_vm2, %v4135_v9, %v4255_v60  ;;  %v1656_v28 = vpop.f32.mrf.mxu0 }
 0x498   : > { %1898 = vrot.lane.b32.xlu0 %v4248_v11, %s3050_s18  ;;  %v1913_v18 = vpop.permute.xlu1 %1912 }
 0x499   : > { %v2309_v44 = vsel %vm2308_vm4, %v2300_v37, %v1913_v18 }
 0x49a   : > { %2229 = vrot.lane.b32.xlu1 %v1639_v22, %s3059_s9  ;;  %v4261_v31 = vpop.permute.xlu0 %1890  ;;  %v4324_v22 = vpop.f32.mrf.mxu1 }
 0x49c   : > { %1922 = vrot.lane.b32.xlu0 %v4248_v11, %s4874_s19  ;;  %v1937_v19 = vpop.permute.xlu1 %1936  ;;  %v4334_v2 = vpop.f32.mrf.mxu1 }
 0x49d   : > { %v2317_v40 = vsel %vm1429_vm1, %v2309_v44, %v1937_v19 }
 0x49e   : > { %1872 = vrot.lane.b32.xlu1 %v4263_v8, %s3044_s12  ;;  %v4269_v5 = vpop.permute.xlu0 %1914  ;;  %v4344_v7 = vpop.f32.mrf.mxu1 }
 0x4a0   : > { %1946 = vrot.lane.b32.xlu0 %v4248_v11, %s3052_s20  ;;  %v1961_v4 = vpop.permute.xlu1 %1960 }
 0x4a1   : > { %v2326_v29 = vsel %vm2325_vm5, %v2317_v40, %v1961_v4  ;;  %v1582_v4 = vadd.f32 %v1581_v47, %v4124_v63  ;;  %v1584_v40 = vadd.f32 %v1583_v14, %v4126_v59 }
 0x4a2   : > { %1896 = vrot.lane.b32.xlu1 %v4263_v8, %s3050_s18  ;;  %v4275_v55 = vpop.permute.xlu0 %1938 }
 0x4a3   : > { %v4376_v37 = vadd.f32 %v1654_v43, %v1582_v4 }
 0x4a4   : > { %1970 = vrot.lane.b32.xlu0 %v4248_v11, %s3053_s26  ;;  %v1985_v45 = vpop.permute.xlu1 %1984 }
 0x4a5   : > { %v2335_v61 = vsel %vm2334_vm6, %v2326_v29, %v1985_v45  ;;  %v2301_v45 = vsel %vm2299_vm3, %v2292_v53, %v4261_v31 }
 0x4a6   : > { %1920 = vrot.lane.b32.xlu1 %v4263_v8, %s4874_s19  ;;  %v4287_v10 = vpop.permute.xlu0 %1962  ;;  %s2598_s19 = sshll.u32 %s4876_s15, 7  ;;  %v2310_v44 = vsel %vm2308_vm4, %v2301_v45, %v4269_v5 }
 0x4a7   : > { %s4311_s15 = scalar_lea.vmem [#allocation6], %s2598_s19  ;;  %v2318_v9 = vsel %vm1429_vm1, %v2310_v44, %v4275_v55  ;;  %s4911_s19 = smov 122  }
 0x4a8   : > { %1994 = vrot.lane.b32.xlu0 %v4248_v11, %s3054_s14  ;;  %v2017_v30 = vpop.permute.xlu1 %2016  ;;  %v2327_v31 = vsel %vm2325_vm5, %v2318_v9, %v4287_v10 }
 0x4a9   : > { %v2049_v16 = vsel %vm2048_vm7, %v2017_v30, %v2019_v56  ;;  %v4354_v56 = vpop.f32.mrf.mxu1  ;;  %v4395_v30 = vadd.f32 %v1656_v28, %v1584_v40  ;;  %v1658_v40 = vpop.f32.mrf.mxu0 }
 0x4aa   : > { %v2344_v12 = vsel %vm2343_vm8, %v2335_v61, %v2049_v16  ;;  %1944 = vrot.lane.b32.xlu1 %v4263_v8, %s3052_s20  ;;  %v1987_v38 = vpop.permute.xlu0 %1986 }
 0x4ab   : > { %v2456_v25 = vadd.f32 %v4215_v54, %v2344_v12  ;;  %v4364_v19 = vpop.f32.mrf.mxu1  ;;  %v2336_v3 = vsel %vm2334_vm6, %v2327_v31, %v1987_v38 }
 0x4ac   : > { %2038 = vrot.lane.b32.xlu0 %v4299_v6, %s3049_s17  ;;  %v4307_v58 = vpop.permute.xlu1 %2065 }
 0x4ad   : > { %v2472_v35 = vmax.f32 %v2456_v25, 0.0  ;;  %v4386_v60 = vpop.f32.mrf.mxu1 }
 0x4ae   : > { %1968 = vrot.lane.b32.xlu1 %v4263_v8, %s3053_s26  ;;  %v2023_v0 = vpop.permute.xlu0 %2022 }
 0x4af   : > { %2488 = vst [vmem:[%s4311_s15] sm:$0xff] %v2472_v35  ;;  %v4401_v10 = vpop.f32.mrf.mxu1 }
 0x4b0   : > { %2075 = vrot.lane.b32.xlu0 %v4299_v6, %s3055_s16  ;;  %v4316_v1 = vpop.permute.xlu1 %2089 }
 0x4b1   : > { %v4412_v38 = vpop.f32.mrf.mxu1 }
 0x4b2   : > { %1992 = vrot.lane.b32.xlu1 %v4263_v8, %s3054_s14  ;;  %v4322_v34 = vpop.permute.xlu0 %2067 }
 0x4b3   : > { %v4420_v35 = vpop.f32.mrf.mxu1 }
 0x4b4   : > { %2099 = vrot.lane.b32.xlu0 %v4299_v6, %s3045_s13  ;;  %v4328_v42 = vpop.permute.xlu1 %2113 }
 0x4b5   : > { %4906 = vst [vmem:[#allocation10_spill] sm:$0xff] %v4328_v42  ;;  %v4428_v4 = vpop.f32.mrf.mxu1 }
 0x4b6   : > { %2032 = vrot.lane.b32.xlu1 %v4263_v8, %s3049_s17  ;;  %v4332_v46 = vpop.permute.xlu0 %2091 }
 0x4b7   : > { %v4438_v44 = vpop.f32.mrf.mxu1 }
 0x4b8   : > { %2123 = vrot.lane.b32.xlu0 %v4299_v6, %s3043_s11  ;;  %v4338_v32 = vpop.permute.xlu1 %2137 }
 0x4b9   : > { %4907 = vst [vmem:[#allocation14_spill] sm:$0xff] %v4338_v32 }
 0x4ba   : > { %2073 = vrot.lane.b32.xlu1 %v4242_v23, %s3055_s16  ;;  %v4342_v52 = vpop.permute.xlu0 %2115 }
 0x4bc   : > { %2147 = vrot.lane.b32.xlu0 %v4299_v6, %s3056_s10  ;;  %v4348_v24 = vpop.permute.xlu1 %2161 }
 0x4bd   : > { %4908 = vst [vmem:[#allocation9_spill] sm:$0xff] %v4348_v24 }
 0x4be   : > { %2097 = vrot.lane.b32.xlu1 %v4242_v23, %s3045_s13  ;;  %v4352_v27 = vpop.permute.xlu0 %2139 }
 0x4c0   : > { %2171 = vrot.lane.b32.xlu0 %v4299_v6, %s3057_s28  ;;  %v4358_v13 = vpop.permute.xlu1 %2185 }
 0x4c1   : > { %4909 = vst [vmem:[#allocation15_spill] sm:$0xff] %v4358_v13 }
 0x4c2   : > { %2121 = vrot.lane.b32.xlu1 %v4242_v23, %s3043_s11  ;;  %v4362_v18 = vpop.permute.xlu0 %2163 }
 0x4c4   : > { %2195 = vrot.lane.b32.xlu0 %v4299_v6, %s3058_s29  ;;  %v4372_v26 = vpop.permute.xlu1 %2217 }
 0x4c5   : > { %4910 = vst [vmem:[#allocation16_spill] sm:$0xff] %v4372_v26 }
 0x4c6   : > { %2145 = vrot.lane.b32.xlu1 %v4242_v23, %s3056_s10  ;;  %v4382_v63 = vpop.permute.xlu0 %2187 }
 0x4c8   : > { %2042 = vrot.lane.b32.xlu0 %v4376_v37, %s3049_s17  ;;  %v2021_v5 = vpop.permute.xlu1 %2020 }
 0x4c9   : > { %v2050_v29 = vsel %vm2048_vm7, %v2021_v5, %v2023_v0 }
 0x4ca   : > { %v2345_v55 = vsel %vm2343_vm8, %v2336_v3, %v2050_v29  ;;  %2169 = vrot.lane.b32.xlu1 %v4242_v23, %s3057_s28  ;;  %v2027_v59 = vpop.permute.xlu0 %2026 }
 0x4cb   : > { %v2458_v47 = vadd.f32 %v4218_v49, %v2345_v55 }
 0x4cc   : > { %1878 = vrot.lane.b32.xlu0 %v4395_v30, %s3044_s12  ;;  %v4405_v61 = vpop.permute.xlu1 %2221 }
 0x4cd   : > { %v2474_v16 = vmax.f32 %v2458_v47, 0.0 }
 0x4ce   : > { %2193 = vrot.lane.b32.xlu1 %v4242_v23, %s3058_s29  ;;  %v4409_v12 = vpop.permute.xlu0 %1870 }
 0x4cf   : > { %2490 = vst [vmem:[%s4311_s15 + $0x10] sm:$0xff] %v2474_v16 }
 0x4d0   : > { %1902 = vrot.lane.b32.xlu0 %v4395_v30, %s3050_s18  ;;  %v1869_v25 = vpop.permute.xlu1 %1868 }
 0x4d1   : > { %v2293_v47 = vsel %vm2290_vm2, %v4184_v62, %v1869_v25 }
 0x4d2   : > { %2233 = vrot.lane.b32.xlu1 %v4242_v23, %s3059_s9  ;;  %v4418_v14 = vpop.permute.xlu0 %1894  ;;  %v1580_v23 = vadd.f32 %v4281_v48, %v4122_v57  ;;  %v4448_v57 = vpop.f32.mrf.mxu1 }
 0x4d3   : > { %v2759_v48 = vpop.f32.mrf.mxu0 }
 0x4d4   : > { %v1893_v0 = vpop.permute.xlu1 %1892  ;;  %1926 = vrot.lane.b32.xlu0 %v4395_v30, %s4911_s19  ;;  %v4440_v28 = vadd.f32 %v1652_v17, %v1580_v23  ;;  %v4460_v29 = vpop.f32.mrf.mxu1 }
 0x4d5   : > { %v2760_v55 = vpop.f32.mrf.mxu0 }
 0x4d6   : > { %2036 = vrot.lane.b32.xlu1 %v4248_v11, %s3049_s17  ;;  %v4426_v43 = vpop.permute.xlu0 %1918 }
 0x4d7   : > { %v2762_v54 = vpop.f32.mrf.mxu0 }
 0x4d8   : > { %v1917_v53 = vpop.permute.xlu1 %1916  ;;  %1950 = vrot.lane.b32.xlu0 %v4395_v30, %s3052_s20 }
 0x4da   : > { %2237 = vrot.lane.b32.xlu1 %v4299_v6, %s3059_s9  ;;  %v4436_v45 = vpop.permute.xlu0 %1942  ;;  %v1586_v6 = vadd.f32 %v4318_v21, %v4128_v51  ;;  %v2302_v51 = vsel %vm2299_vm3, %v2293_v47, %v1893_v0 }
 0x4db   : > { %v2311_v21 = vsel %vm2308_vm4, %v2302_v51, %v1917_v53 }
 0x4dc   : > { %v1941_v9 = vpop.permute.xlu1 %1940  ;;  %1974 = vrot.lane.b32.xlu0 %v4395_v30, %s3053_s26  ;;  %v4454_v17 = vadd.f32 %v1658_v40, %v1586_v6  ;;  %v4473_v6 = vpop.f32.mrf.mxu1 }
 0x4dd   : > { %v2319_v40 = vsel %vm1429_vm1, %v2311_v21, %v1941_v9 }
 0x4de   : > { %1876 = vrot.lane.b32.xlu1 %v4440_v28, %s3044_s12  ;;  %v4446_v31 = vpop.permute.xlu0 %1966  ;;  %v4483_v51 = vpop.f32.mrf.mxu1  ;;  %s2693_s12 = sshll.u32 %s3120_s25, 11  ;;  %s4920_s25 = sand.u32 1, %s3026_s22  }
 0x4e0   : > { %v1965_v5 = vpop.permute.xlu1 %1964  ;;  %1998 = vrot.lane.b32.xlu0 %v4395_v30, %s3054_s14 }
 0x4e1   : > { %v2328_v62 = vsel %vm2325_vm5, %v2319_v40, %v1965_v5  ;;  %v2763_v5 = vpop.f32.mrf.mxu0 }
 0x4e2   : > { %1900 = vrot.lane.b32.xlu1 %v4440_v28, %s3050_s18  ;;  %v4458_v3 = vpop.permute.xlu0 %1990 }
 0x4e4   : > { %v1989_v16 = vpop.permute.xlu1 %1988  ;;  %2046 = vrot.lane.b32.xlu0 %v4454_v17, %s3049_s17 }
 0x4e5   : > { %v2337_v0 = vsel %vm2334_vm6, %v2328_v62, %v1989_v16  ;;  %v4490_v16 = vpop.f32.mrf.mxu1  ;;  %v2765_v62 = vpop.f32.mrf.mxu0 }
 0x4e6   : > { %1924 = vrot.lane.b32.xlu1 %v4440_v28, %s4911_s19  ;;  %v4470_v23 = vpop.permute.xlu0 %2030 }
 0x4e8   : > { %v2025_v25 = vpop.permute.xlu1 %2024  ;;  %2079 = vrot.lane.b32.xlu0 %v4454_v17, %s3055_s16 }
 0x4e9   : > { %v2051_v53 = vsel %vm2048_vm7, %v2025_v25, %v2027_v59 }
 0x4ea   : > { %v2346_v47 = vsel %vm2343_vm8, %v2337_v0, %v2051_v53  ;;  %1948 = vrot.lane.b32.xlu1 %v4440_v28, %s3052_s20  ;;  %v2072_v9 = vpop.permute.xlu0 %2071  ;;  %s4805_s20 = scalar_lea.hbm %s4859_s6, %s2693_s12 }
 0x4eb   : > { %v2460_v21 = vadd.f32 %v4222_v39, %v2346_v47  ;;  %v2766_v39 = vpop.f32.mrf.mxu0 }
 0x4ec   : > { %v2070_v40 = vpop.permute.xlu1 %2069  ;;  %2103 = vrot.lane.b32.xlu0 %v4454_v17, %s3045_s13 }
 0x4ed   : > { %v2476_v13 = vmax.f32 %v2460_v21, 0.0  ;;  %v2819_v21 = vpop.f32.mrf.mxu1  ;;  %v2768_v32 = vpop.f32.mrf.mxu0 }
 0x4ee   : > { %1972 = vrot.lane.b32.xlu1 %v4440_v28, %s3053_s26  ;;  %v2096_v59 = vpop.permute.xlu0 %2095  ;;  %s4813_s26 = scalar_lea.sflag [#allocation5], %s4920_s25 }
 0x4ef   : > { %2492 = vst [vmem:[%s4311_s15 + $0x20] sm:$0xff] %v2476_v13  ;;  %v2355_v25 = vsel %vm2290_vm2, %v2072_v9, %v2096_v59  ;;  %v2721_v9 = vadd.f32 %v4334_v2, %v4324_v22  ;;  %v2761_v59 = vadd.f32 %v2760_v55, %v2759_v48  ;;  %v2769_v55 = vpop.f32.mrf.mxu0 }
 0x4f0   : > { %v2094_v0 = vpop.permute.xlu1 %2093  ;;  %2127 = vrot.lane.b32.xlu0 %v4454_v17, %s3043_s11 }
 0x4f1   : > { %v2354_v53 = vsel %vm2290_vm2, %v2070_v40, %v2094_v0  ;;  %v1825_v0 = vpop.f32.mrf.mxu1  ;;  %v1761_v22 = vadd.f32 %v2761_v59, %v2721_v9  ;;  %v2727_v59 = vadd.f32 %v4386_v60, %v4364_v19  ;;  %v2730_v19 = vadd.f32 %v4412_v38, %v4401_v10 }
 0x4f2   : > { %1996 = vrot.lane.b32.xlu1 %v4440_v28, %s3054_s14  ;;  %v2120_v47 = vpop.permute.xlu0 %2119 }
 0x4f3   : > { %v2363_v24 = vsel %vm2299_vm3, %v2355_v25, %v2120_v47  ;;  %v2820_v48 = vpop.f32.mrf.mxu1 }
 0x4f4   : > { %v2118_v26 = vpop.permute.xlu1 %2117  ;;  %2151 = vrot.lane.b32.xlu0 %v4454_v17, %s3056_s10 }
 0x4f5   : > { %v2362_v13 = vsel %vm2299_vm3, %v2354_v53, %v2118_v26  ;;  %v2724_v26 = vadd.f32 %v4354_v56, %v4344_v7  ;;  %v2764_v53 = vadd.f32 %v2763_v5, %v2762_v54  ;;  %v1828_v7 = vpop.f32.mrf.mxu1  ;;  %v2771_v56 = vpop.f32.mrf.mxu0 }
 0x4f6   : > { %2040 = vrot.lane.b32.xlu1 %v4440_v28, %s3049_s17  ;;  %v2144_v40 = vpop.permute.xlu0 %2143 }
 0x4f7   : > { %v2371_v42 = vsel %vm2308_vm4, %v2363_v24, %v2144_v40 }
 0x4f8   : > { %v2142_v36 = vpop.permute.xlu1 %2141  ;;  %2175 = vrot.lane.b32.xlu0 %v4454_v17, %s3057_s28 }
 0x4f9   : > { %v2370_v25 = vsel %vm2308_vm4, %v2362_v13, %v2142_v36  ;;  %v4519_v36 = vadd.f32 %v1825_v0, %v1761_v22  ;;  %v1764_v13 = vadd.f32 %v2764_v53, %v2724_v26  ;;  %v2767_v0 = vadd.f32 %v2766_v39, %v2765_v62  ;;  %v2772_v53 = vpop.f32.mrf.mxu0 }
 0x4fa   : > { %2077 = vrot.lane.b32.xlu1 %v4376_v37, %s3055_s16  ;;  %v2168_v2 = vpop.permute.xlu0 %2167  ;;  %v2294_v22 = vsel %vm2290_vm2, %v4181_v20, %v4409_v12  ;;  %v2770_v62 = vadd.f32 %v2769_v55, %v2768_v32  ;;  %s3061_s16 = smov [#allocation6]  }
 0x4fb   : > { %v2379_v47 = vsel %vm1429_vm1, %v2371_v42, %v2168_v2  ;;  %v1769_v60 = vadd.f32 %v2767_v0, %v2727_v59  ;;  %v2774_v12 = vpop.f32.mrf.mxu0 }
 0x4fc   : > { %v2166_v24 = vpop.permute.xlu1 %2165  ;;  %2199 = vrot.lane.b32.xlu0 %v4454_v17, %s3058_s29 }
 0x4fd   : > { %v2378_v40 = vsel %vm1429_vm1, %v2370_v25, %v2166_v24  ;;  %v1829_v25 = vadd.f32 %v1828_v7, %v1764_v13  ;;  %v1834_v38 = vadd.f32 %v2819_v21, %v1769_v60  ;;  %v2775_v13 = vpop.f32.mrf.mxu0 }
 0x4fe   : > { %2101 = vrot.lane.b32.xlu1 %v4376_v37, %s3045_s13  ;;  %v2192_v54 = vpop.permute.xlu0 %2191  ;;  %s2518_s13 = sshll.u32 %s4311_s15, 4  ;;  %s4807_s13 = int_to_ptr.vmem [resolvable:$true] %s2518_s13 }
 0x4ff   : > { %v4524_v5 = vsel %vm2325_vm5, %v2379_v47, %v2192_v54  ;;  %v2303_v47 = vsel %vm2299_vm3, %v2294_v22, %v4418_v14  ;;  %s2970_s14 = scalar_lea.vmem %s4807_s13, 2048 }
 0x500   : > { %v2190_v9 = vpop.permute.xlu1 %2189  ;;  %2219 = vrot.lane.b32.xlu0 %v4519_v36, %s3059_s9  ;;  %v2312_v39 = vsel %vm2308_vm4, %v2303_v47, %v4426_v43  ;;  %v1772_v43 = vadd.f32 %v2770_v62, %v2730_v19  ;;  %v2736_v47 = vadd.f32 %v4448_v57, %v4438_v44  ;;  %p2971_p6 = scmp.ne.s32.totalorder %s4807_s13, %s2970_s14 }
 0x501   : > { %v4529_v42 = vsel %vm2325_vm5, %v2378_v40, %v2190_v9  ;;  %v2320_v20 = vsel %vm1429_vm1, %v2312_v39, %v4436_v45  ;;  %v2773_v9 = vadd.f32 %v2772_v53, %v2771_v56  ;;  %v2776_v39 = vadd.f32 %v2775_v13, %v2774_v12 }
 0x502   : > { %2125 = vrot.lane.b32.xlu1 %v4376_v37, %s3043_s11  ;;  %v4535_v26 = vpop.permute.xlu0 %2034  ;;  %v2329_v14 = vsel %vm2325_vm5, %v2320_v20, %v4446_v31  ;;  %s3060_s11 = smov 98   ;;  %v2823_v31 = vpop.f32.mrf.mxu1  ;;  %v1837_v21 = vadd.f32 %v2820_v48, %v1772_v43  ;;  %v2742_v43 = vadd.f32 %v4490_v16, %v4483_v51  ;;  %p2972_p9 = pnand %p2971_p6, %p3137_p5 }
 0x503   : > { %v2338_v10 = vsel %vm2334_vm6, %v2329_v14, %v4458_v3  ;;  %v1780_v60 = vadd.f32 %v2776_v39, %v2736_v47 }
 0x504   : > { %v4540_v2 = vpop.permute.xlu1 %2225  ;;  %2223 = vrot.lane.b32.xlu0 %v1829_v25, %s3059_s9  ;;  %v1841_v0 = vpop.f32.mrf.mxu1  ;;  %p2973_p10 = pneg %p2972_p9 }
 0x506   : > { %2149 = vrot.lane.b32.xlu1 %v4376_v37, %s3056_s10  ;;  %v4551_v24 = vpop.permute.xlu0 %1874  ;;  %s2974_s10 = sshll.u32 %s3061_s16, 4  ;;  %s2975_s10 = int_to_ptr.vmem [resolvable:$false] %s2974_s10 }
 0x507   : > { %p2977_p11 = scmp.lt.s32.totalorder %s4807_s13, %s2975_s10 }
 0x508   : > { %v2029_v40 = vpop.permute.xlu1 %2028  ;;  %2268 = vrot.lane.b32.xlu0 %v1829_v25, %s3060_s11  ;;  %v2777_v25 = vpop.f32.mrf.mxu0 }
 0x509   : > { %v2052_v32 = vsel %vm2048_vm7, %v2029_v40, %v4470_v23  ;;  %v2733_v23 = vadd.f32 %v4428_v4, %v4420_v35  ;;  %v2824_v4 = vpop.f32.mrf.mxu1 }
 0x50a   : > { %v2347_v55 = vsel %vm2343_vm8, %v2338_v10, %v2052_v32  ;;  %2173 = vrot.lane.b32.xlu1 %v4376_v37, %s3057_s28  ;;  %v4565_v45 = vpop.permute.xlu0 %1898  ;;  %v2778_v48 = vpop.f32.mrf.mxu0  ;;  %s2976_s28 = scalar_lea.vmem %s2975_s10, 4096 }
 0x50b   : > { %v2462_v54 = vadd.f32 %v4225_v41, %v2347_v55  ;;  %v1777_v19 = vadd.f32 %v2773_v9, %v2733_v23  ;;  %v1844_v44 = vpop.f32.mrf.mxu1  ;;  %v2779_v12 = vadd.f32 %v2778_v48, %v2777_v25  ;;  %p2978_p12 = scmp.lt.s32.totalorder %s2976_s28, %s2970_s14 }
 0x50c   : > { %v4568_v7 = vpop.permute.xlu1 %2229  ;;  %2227 = vrot.lane.b32.xlu0 %v1834_v38, %s3059_s9  ;;  %v2780_v57 = vpop.f32.mrf.mxu0  ;;  %v1845_v14 = vadd.f32 %v1844_v44, %v1780_v60 }
 0x50d   : > { %v2478_v3 = vmax.f32 %v2462_v54, 0.0  ;;  %v1842_v53 = vadd.f32 %v1841_v0, %v1777_v19  ;;  %p2979_p13 = por %p2978_p12, %p2977_p11 }
 0x50e   : > { %2197 = vrot.lane.b32.xlu1 %v4376_v37, %s3058_s29  ;;  %v4575_v59 = vpop.permute.xlu0 %1922  ;;  %v2781_v10 = vpop.f32.mrf.mxu0 }
 0x50f   : > { %2494 = vst [vmem:[%s4311_s15 + $0x30] sm:$0xff] %v2478_v3  ;;  %v2782_v13 = vadd.f32 %v2781_v10, %v2780_v57  ;;  %p2980_p0 = pnand %p2979_p13, %p2973_p10 }
 0x510   : > { %v1873_v22 = vpop.permute.xlu1 %1872  ;;  %2231 = vrot.lane.b32.xlu0 %v1837_v21, %s3059_s9 }
 0x511   : > { %v2295_v23 = vsel %vm2290_vm2, %v4263_v8, %v1873_v22 }
 0x512   : > { %2241 = vrot.lane.b32.xlu1 %v4376_v37, %s3059_s9  ;;  %v4583_v35 = vpop.permute.xlu0 %1946  ;;  %v2739_v37 = vadd.f32 %v4473_v6, %v4460_v29 }
 0x514   : > { %v1897_v56 = vpop.permute.xlu1 %1896  ;;  %2272 = vrot.lane.b32.xlu0 %v1837_v21, %s3060_s11  ;;  %v1785_v55 = vadd.f32 %v2779_v12, %v2739_v37 }
 0x515   : > { %v2304_v51 = vsel %vm2299_vm3, %v2295_v23, %v1897_v56 }
 0x516   : > { %2044 = vrot.lane.b32.xlu1 %v4395_v30, %s3049_s17  ;;  %v4588_v62 = vpop.permute.xlu0 %1970  ;;  %v1850_v54 = vadd.f32 %v2823_v31, %v1785_v55 }
 0x518   : > { %v1921_v20 = vpop.permute.xlu1 %1920  ;;  %2235 = vrot.lane.b32.xlu0 %v1842_v53, %s3059_s9 }
 0x51a   : > { %2245 = vrot.lane.b32.xlu1 %v4454_v17, %s3059_s9  ;;  %v4595_v40 = vpop.permute.xlu0 %1994  ;;  %v1788_v17 = vadd.f32 %v2782_v13, %v2742_v43 }
 0x51c   : > { %v1945_v32 = vpop.permute.xlu1 %1944  ;;  %2239 = vrot.lane.b32.xlu0 %v1845_v14, %s3059_s9  ;;  %v1853_v16 = vadd.f32 %v2824_v4, %v1788_v17 }
 0x51e   : > { %2266 = vrot.lane.b32.xlu1 %v4519_v36, %s3060_s11  ;;  %v2039_v29 = vpop.permute.xlu0 %2038  ;;  %v2313_v36 = vsel %vm2308_vm4, %v2304_v51, %v1921_v20 }
 0x51f   : > { %v2321_v31 = vsel %vm1429_vm1, %v2313_v36, %v1945_v32 }
 0x520   : > { %v1969_v6 = vpop.permute.xlu1 %1968  ;;  %2276 = vrot.lane.b32.xlu0 %v1845_v14, %s3060_s11 }
 0x521   : > { %v2330_v0 = vsel %vm2325_vm5, %v2321_v31, %v1969_v6 }
 0x522   : > { %2270 = vrot.lane.b32.xlu1 %v1834_v38, %s3060_s11  ;;  %v2076_v3 = vpop.permute.xlu0 %2075 }
 0x524   : > { %v1993_v21 = vpop.permute.xlu1 %1992  ;;  %2243 = vrot.lane.b32.xlu0 %v1850_v54, %s3059_s9 }
 0x525   : > { %v2339_v8 = vsel %vm2334_vm6, %v2330_v0, %v1993_v21 }
 0x526   : > { %2274 = vrot.lane.b32.xlu1 %v1842_v53, %s3060_s11  ;;  %v2100_v9 = vpop.permute.xlu0 %2099 }
 0x527   : > { %v2357_v38 = vsel %vm2290_vm2, %v2076_v3, %v2100_v9 }
 0x528   : > { %v2033_v25 = vpop.permute.xlu1 %2032  ;;  %2247 = vrot.lane.b32.xlu0 %v1853_v16, %s3059_s9 }
 0x529   : > { %v2053_v22 = vsel %vm2048_vm7, %v2033_v25, %v4535_v26 }
 0x52a   : > { %v2348_v47 = vsel %vm2343_vm8, %v2339_v8, %v2053_v22  ;;  %2278 = vrot.lane.b32.xlu1 %v1850_v54, %s3060_s11  ;;  %v2124_v39 = vpop.permute.xlu0 %2123 }
 0x52b   : > { %v2464_v19 = vadd.f32 %v4229_v33, %v2348_v47  ;;  %v2365_v4 = vsel %vm2299_vm3, %v2357_v38, %v2124_v39 }
 0x52c   : > { %v2074_v48 = vpop.permute.xlu1 %2073  ;;  %2280 = vrot.lane.b32.xlu0 %v1853_v16, %s3060_s11  ;;  %v2296_v16 = vsel %vm2290_vm2, %v4248_v11, %v4551_v24 }
 0x52d   : > { %v2480_v56 = vmax.f32 %v2464_v19, 0.0  ;;  %v2305_v9 = vsel %vm2299_vm3, %v2296_v16, %v4565_v45 }
 0x52e   : > { %v2148_v53 = vpop.permute.xlu0 %2147  ;;  %v2314_v31 = vsel %vm2308_vm4, %v2305_v9, %v4575_v59 }
 0x52f   : > { %2496 = vst [vmem:[%s4311_s15 + $0x40] sm:$0xff] %v2480_v56  ;;  %v2373_v60 = vsel %vm2308_vm4, %v2365_v4, %v2148_v53 }
 0x530   : > { %v2098_v44 = vpop.permute.xlu1 %2097 }
 0x531   : > { %v2356_v26 = vsel %vm2290_vm2, %v2074_v48, %v2098_v44 }
 0x532   : > { %v2172_v57 = vpop.permute.xlu0 %2171 }
 0x533   : > { %v2381_v20 = vsel %vm1429_vm1, %v2373_v60, %v2172_v57 }
 0x534   : > { %v2122_v37 = vpop.permute.xlu1 %2121 }
 0x535   : > { %v2364_v12 = vsel %vm2299_vm3, %v2356_v26, %v2122_v37 }
 0x536   : > { %v2196_v14 = vpop.permute.xlu0 %2195 }
 0x537   : > { %v4628_v10 = vsel %vm2325_vm5, %v2381_v20, %v2196_v14 }
 0x538   : > { %v2146_v32 = vpop.permute.xlu1 %2145 }
 0x539   : > { %v2372_v43 = vsel %vm2308_vm4, %v2364_v12, %v2146_v32 }
 0x53a   : > { %v2043_v55 = vpop.permute.xlu0 %2042 }
 0x53c   : > { %v2170_v13 = vpop.permute.xlu1 %2169 }
 0x53d   : > { %v2380_v6 = vsel %vm1429_vm1, %v2372_v43, %v2170_v13 }
 0x53e   : > { %v1879_v54 = vpop.permute.xlu0 %1878 }
 0x53f   : > { %v2298_v23 = vsel %vm2290_vm2, %v4395_v30, %v1879_v54  ;;  %v2322_v30 = vsel %vm1429_vm1, %v2314_v31, %v4583_v35 }
 0x540   : > { %v2194_v17 = vpop.permute.xlu1 %2193  ;;  %v2331_v0 = vsel %vm2325_vm5, %v2322_v30, %v4588_v62 }
 0x541   : > { %v4633_v3 = vsel %vm2325_vm5, %v2380_v6, %v2194_v17  ;;  %v2340_v11 = vsel %vm2334_vm6, %v2331_v0, %v4595_v40 }
 0x542   : > { %v1903_v21 = vpop.permute.xlu0 %1902 }
 0x543   : > { %v4638_v51 = vsel %vm2299_vm3, %v2298_v23, %v1903_v21 }
 0x544   : > { %v4643_v36 = vpop.permute.xlu1 %2233 }
 0x546   : > { %v4649_v38 = vpop.permute.xlu0 %1926 }
 0x548   : > { %v2037_v25 = vpop.permute.xlu1 %2036 }
 0x549   : > { %v2054_v24 = vsel %vm2048_vm7, %v2037_v25, %v2039_v29 }
 0x54a   : > { %v2349_v8 = vsel %vm2343_vm8, %v2340_v11, %v2054_v24  ;;  %v1951_v45 = vpop.permute.xlu0 %1950 }
 0x54b   : > { %v2466_v22 = vadd.f32 %v4232_v50, %v2349_v8 }
 0x54c   : > { %v4660_v59 = vpop.permute.xlu1 %2237 }
 0x54d   : > { %v2482_v47 = vmax.f32 %v2466_v22, 0.0 }
 0x54e   : > { %v1975_v39 = vpop.permute.xlu0 %1974 }
 0x54f   : > { %2498 = vst [vmem:[%s4311_s15 + $0x50] sm:$0xff] %v2482_v47 }
 0x550   : > { %v1877_v35 = vpop.permute.xlu1 %1876 }
 0x551   : > { %v2297_v44 = vsel %vm2290_vm2, %v4440_v28, %v1877_v35 }
 0x552   : > { %v1999_v19 = vpop.permute.xlu0 %1998 }
 0x554   : > { %v1901_v4 = vpop.permute.xlu1 %1900 }
 0x555   : > { %v2306_v57 = vsel %vm2299_vm3, %v2297_v44, %v1901_v4 }
 0x556   : > { %v2047_v62 = vpop.permute.xlu0 %2046 }
 0x558   : > { %v1925_v48 = vpop.permute.xlu1 %1924 }
 0x559   : > { %v2315_v20 = vsel %vm2308_vm4, %v2306_v57, %v1925_v48 }
 0x55a   : > { %v4663_v56 = vpop.permute.xlu0 %2079 }
 0x55c   : > { %v1949_v40 = vpop.permute.xlu1 %1948 }
 0x55d   : > { %v2323_v12 = vsel %vm1429_vm1, %v2315_v20, %v1949_v40 }
 0x55e   : > { %v4665_v53 = vpop.permute.xlu0 %2103 }
 0x560   : > { %v1973_v29 = vpop.permute.xlu1 %1972 }
 0x561   : > { %v2332_v14 = vsel %vm2325_vm5, %v2323_v12, %v1973_v29 }
 0x562   : > { %v4667_v60 = vpop.permute.xlu0 %2127 }
 0x564   : > { %v1997_v26 = vpop.permute.xlu1 %1996 }
 0x565   : > { %v2341_v43 = vsel %vm2334_vm6, %v2332_v14, %v1997_v26 }
 0x566   : > { %v4673_v37 = vpop.permute.xlu0 %2151 }
 0x568   : > { %v2041_v32 = vpop.permute.xlu1 %2040 }
 0x569   : > { %v2055_v13 = vsel %vm2048_vm7, %v2041_v32, %v2043_v55  ;;  %v2353_v55 = vsel %vm2290_vm2, %v4322_v34, %v4332_v46 }
 0x56a   : > { %v2350_v6 = vsel %vm2343_vm8, %v2341_v43, %v2055_v13  ;;  %v4680_v28 = vpop.permute.xlu0 %2175  ;;  %v2361_v30 = vsel %vm2299_vm3, %v2353_v55, %v4342_v52  ;;  %v4913_v13 = vld [vmem:[#allocation10_spill] sm:$0xff]  ;;  %v4916_v55 = vld [vmem:[#allocation9_spill] sm:$0xff] }
 0x56b   : > { %v2468_v54 = vadd.f32 %v4236_v15, %v2350_v6  ;;  %v2369_v25 = vsel %vm2308_vm4, %v2361_v30, %v4352_v27  ;;  %v4914_v6 = vld [vmem:[#allocation14_spill] sm:$0xff] }
 0x56c   : > { %v4683_v17 = vpop.permute.xlu1 %2077  ;;  %v2377_v24 = vsel %vm1429_vm1, %v2369_v25, %v4362_v18  ;;  %v4917_v25 = vld [vmem:[#allocation15_spill] sm:$0xff] }
 0x56d   : > { %v2484_v23 = vmax.f32 %v2468_v54, 0.0  ;;  %v2385_v34 = vsel %vm2325_vm5, %v2377_v24, %v4382_v63  ;;  %v2316_v63 = vsel %vm2308_vm4, %v4638_v51, %v4649_v38  ;;  %v4915_v54 = vld [vmem:[#allocation16_spill] sm:$0xff] }
 0x56e   : > { %v4685_v21 = vpop.permute.xlu0 %2199  ;;  %v2324_v44 = vsel %vm1429_vm1, %v2316_v63, %v1951_v45  ;;  %v4912_v45 = vld [vmem:[#allocation11_spill] sm:$0xff] }
 0x56f   : > { %2500 = vst [vmem:[%s4311_s15 + $0x60] sm:$0xff] %v2484_v23  ;;  %v2333_v57 = vsel %vm2325_vm5, %v2324_v44, %v1975_v39 }
 0x570   : > { %v4688_v16 = vpop.permute.xlu1 %2101 }
 0x572   : > { %v2220_v9 = vpop.permute.xlu0 %2219 }
 0x574   : > { %v4690_v31 = vpop.permute.xlu1 %2125 }
 0x576   : > { %v2224_v0 = vpop.permute.xlu0 %2223 }
 0x577   : > { %v2251_v11 = vsel %vm2249_vm9, %v4405_v61, %v2224_v0 }
 0x578   : > { %v4703_v8 = vpop.permute.xlu1 %2149  ;;  %v2393_v46 = vsel %vm2334_vm6, %v2385_v34, %v2251_v11 }
 0x57a   : > { %v2269_v22 = vpop.permute.xlu0 %2268 }
 0x57b   : > { %v2401_v52 = vsel %vm2343_vm8, %v2393_v46, %v2269_v22  ;;  %v4918_v22 = vld [vmem:[#allocation13_spill] sm:$0xff] }
 0x57c   : > { %v2459_v47 = vadd.f32 %v4218_v49, %v2401_v52  ;;  %v4710_v35 = vpop.permute.xlu1 %2173 }
 0x57e   : > { %v2475_v27 = vmax.f32 %v2459_v47, 0.0  ;;  %v2228_v4 = vpop.permute.xlu0 %2227 }
 0x580   : > { %2491 = vst [vmem:[%s4311_s15 + $0x18] sm:$0xff] %v2475_v27  ;;  %v4713_v61 = vpop.permute.xlu1 %2197 }
 0x582   : > { %v2232_v18 = vpop.permute.xlu0 %2231 }
 0x583   : > { %v2253_v48 = vsel %vm2249_vm9, %v4568_v7, %v2232_v18  ;;  %v2342_v7 = vsel %vm2334_vm6, %v2333_v57, %v1999_v19 }
 0x584   : > { %v2242_v40 = vpop.permute.xlu1 %2241  ;;  %v2395_v49 = vsel %vm2334_vm6, %v4524_v5, %v2253_v48  ;;  %v2352_v5 = vsel %vm2290_vm2, %v4307_v58, %v4316_v1 }
 0x585   : > { %v2360_v39 = vsel %vm2299_vm3, %v2352_v5, %v4913_v13 }
 0x586   : > { %v2273_v29 = vpop.permute.xlu0 %2272  ;;  %v2368_v19 = vsel %vm2308_vm4, %v2360_v39, %v4914_v6 }
 0x587   : > { %v2403_v26 = vsel %vm2343_vm8, %v2395_v49, %v2273_v29  ;;  %v2376_v30 = vsel %vm1429_vm1, %v2368_v19, %v4916_v55  ;;  %v4919_v49 = vld [vmem:[#allocation12_spill] sm:$0xff] }
 0x588   : > { %v2463_v20 = vadd.f32 %v4225_v41, %v2403_v26  ;;  %v2045_v12 = vpop.permute.xlu1 %2044  ;;  %v2384_v58 = vsel %vm2325_vm5, %v2376_v30, %v4917_v25  ;;  %v2358_v26 = vsel %vm2290_vm2, %v4683_v17, %v4688_v16 }
 0x589   : > { %v2056_v14 = vsel %vm2048_vm7, %v2045_v12, %v2047_v62  ;;  %v2250_v62 = vsel %vm2249_vm9, %v4915_v54, %v2220_v9  ;;  %v2252_v9 = vsel %vm2249_vm9, %v4540_v2, %v2228_v4 }
 0x58a   : > { %v2479_v51 = vmax.f32 %v2463_v20, 0.0  ;;  %v2351_v38 = vsel %vm2343_vm8, %v2342_v7, %v2056_v14  ;;  %v2236_v32 = vpop.permute.xlu0 %2235  ;;  %v2392_v24 = vsel %vm2334_vm6, %v2384_v58, %v2250_v62  ;;  %v2394_v63 = vsel %vm2334_vm6, %v4529_v42, %v2252_v9 }
 0x58b   : > { %v2470_v43 = vadd.f32 %v4912_v45, %v2351_v38  ;;  %v2359_v20 = vsel %vm2290_vm2, %v4663_v56, %v4665_v53 }
 0x58c   : > { %2495 = vst [vmem:[%s4311_s15 + $0x38] sm:$0xff] %v2479_v51  ;;  %v2246_v41 = vpop.permute.xlu1 %2245  ;;  %v2367_v16 = vsel %vm2299_vm3, %v2359_v20, %v4667_v60 }
 0x58d   : > { %v2486_v23 = vmax.f32 %v2470_v43, 0.0  ;;  %v2375_v53 = vsel %vm2308_vm4, %v2367_v16, %v4673_v37 }
 0x58e   : > { %v2240_v0 = vpop.permute.xlu0 %2239  ;;  %v2383_v60 = vsel %vm1429_vm1, %v2375_v53, %v4680_v28 }
 0x58f   : > { %2502 = vst [vmem:[%s4311_s15 + $0x70] sm:$0xff] %v2486_v23  ;;  %v2255_v1 = vsel %vm2249_vm9, %v4660_v59, %v2240_v0 }
 0x590   : > { %v2267_v11 = vpop.permute.xlu1 %2266  ;;  %v2397_v34 = vsel %vm2334_vm6, %v4628_v10, %v2255_v1  ;;  %v2254_v10 = vsel %vm2249_vm9, %v4643_v36, %v2236_v32 }
 0x591   : > { %v2400_v46 = vsel %vm2343_vm8, %v2392_v24, %v2267_v11  ;;  %v2396_v36 = vsel %vm2334_vm6, %v4633_v3, %v2254_v10 }
 0x592   : > { %v2457_v52 = vadd.f32 %v4918_v22, %v2400_v46  ;;  %v2277_v47 = vpop.permute.xlu0 %2276 }
 0x593   : > { %v2405_v27 = vsel %vm2343_vm8, %v2397_v34, %v2277_v47 }
 0x594   : > { %v2473_v18 = vmax.f32 %v2457_v52, 0.0  ;;  %v2467_v59 = vadd.f32 %v4232_v50, %v2405_v27  ;;  %v2271_v48 = vpop.permute.xlu1 %2270  ;;  %v2366_v50 = vsel %vm2299_vm3, %v2358_v26, %v4690_v31 }
 0x595   : > { %v2402_v2 = vsel %vm2343_vm8, %v2394_v63, %v2271_v48  ;;  %v2374_v12 = vsel %vm2308_vm4, %v2366_v50, %v4703_v8 }
 0x596   : > { %2489 = vst [vmem:[%s4311_s15 + $0x8] sm:$0xff] %v2473_v18  ;;  %v2483_v4 = vmax.f32 %v2467_v59, 0.0  ;;  %v2461_v29 = vadd.f32 %v4919_v49, %v2402_v2  ;;  %v2244_v44 = vpop.permute.xlu0 %2243  ;;  %v2382_v31 = vsel %vm1429_vm1, %v2374_v12, %v4710_v35 }
 0x597   : > { %v2256_v7 = vsel %vm2249_vm9, %v2242_v40, %v2244_v44  ;;  %v2390_v8 = vsel %vm2325_vm5, %v2382_v31, %v4713_v61 }
 0x598   : > { %2499 = vst [vmem:[%s4311_s15 + $0x58] sm:$0xff] %v2483_v4  ;;  %v2477_v42 = vmax.f32 %v2461_v29, 0.0  ;;  %v2275_v57 = vpop.permute.xlu1 %2274  ;;  %v2398_v51 = vsel %vm2334_vm6, %v2390_v8, %v2256_v7 }
 0x599   : > { %v2404_v17 = vsel %vm2343_vm8, %v2396_v36, %v2275_v57 }
 0x59a   : > { %2493 = vst [vmem:[%s4311_s15 + $0x28] sm:$0xff] %v2477_v42  ;;  %v2465_v3 = vadd.f32 %v4229_v33, %v2404_v17  ;;  %v2248_v56 = vpop.permute.xlu0 %2247  ;;  %v2391_v33 = vsel %vm2325_vm5, %v2383_v60, %v4685_v21 }
 0x59b   : > { %v2257_v40 = vsel %vm2249_vm9, %v2246_v41, %v2248_v56 }
 0x59c   : > { %v2481_v14 = vmax.f32 %v2465_v3, 0.0  ;;  %v2279_v35 = vpop.permute.xlu1 %2278  ;;  %v2399_v38 = vsel %vm2334_vm6, %v2391_v33, %v2257_v40 }
 0x59d   : > { %v2406_v37 = vsel %vm2343_vm8, %v2398_v51, %v2279_v35 }
 0x59e   : > { %2497 = vst [vmem:[%s4311_s15 + $0x48] sm:$0xff] %v2481_v14  ;;  %v2469_v61 = vadd.f32 %v4236_v15, %v2406_v37  ;;  %v2281_v32 = vpop.permute.xlu0 %2280 }
 0x59f   : > { %v2407_v28 = vsel %vm2343_vm8, %v2399_v38, %v2281_v32 }
 0x5a0   : > { %v2485_v5 = vmax.f32 %v2469_v61, 0.0  ;;  %v2471_v43 = vadd.f32 %v4912_v45, %v2407_v28 }
 0x5a2   : > { %2501 = vst [vmem:[%s4311_s15 + $0x68] sm:$0xff] %v2485_v5  ;;  %v2487_v15 = vmax.f32 %v2471_v43, 0.0 }
 0x5a4   : > { %2503 = vst [vmem:[%s4311_s15 + $0x78] sm:$0xff] %v2487_v15 }
 0x5a5   : > { %2983 = shalt.err (!%p2980_p0)
}
 0x5a6   : > { %s2984_s29 = scalar_lea.hbm %s4805_s20, 2048  ;;  %s2988_s19 = scalar_lea.hbm %s4859_s6, 4096 }
 0x5a7   : > { %p2985_p1 = scmp.ne.s32.totalorder %s4805_s20, %s2984_s29  ;;  %p2989_p4 = scmp.lt.s32.totalorder %s4805_s20, %s4859_s6 }
 0x5a8   : > { %p2990_p7 = scmp.lt.s32.totalorder %s2988_s19, %s2984_s29 }
 0x5a9   : > { %p2986_p2 = pnand %p2985_p1, %p3137_p5 }
 0x5aa   : > { %p2991_p8 = por %p2990_p7, %p2989_p4 }
 0x5ab   : > { %p2987_p3 = pneg %p2986_p2 }
 0x5ad   : > { %p2992_p6 = pnand %p2991_p8, %p2987_p3 }
 0x5af   : > { %2995 = shalt.err (!%p2992_p6)
}
 0x5b0   : > { %s3062_s17 = smov 256   ;;  %s3063_s18 = smov 16  }
 0x5b1   : > { %2831 = dma.vmem_to_hbm [thread:$0]  (%p3137_p5), %s4807_s13, 2048, %s4805_s20, %s4813_s26, %s3062_s17, %s3062_s17, %s3063_s18  }
 0x5b2 PF: > { %p2843_p9 = scmp.ge.s32.totalorder %s3034_s24, 2  ;;  %s2533_s25 = sand.u32 1, %s3022_s21  }
 0x5b3   : > { %p4921_p10 = scmp.ne.s32.totalorder %s4881_s8, 0  ;;  %s2534_s14 = scalar_lea.sflag [#allocation5], %s2533_s25 }
 0x5b5   : > { %p2838_p11 = pnand %p2843_p9, %p4921_p10 }
 0x5b7   : > { %p2839_p12 = pneg %p2838_p11 }
 0x5b9   : > { %3017 = dma.done.wait (%p2839_p12), %s2534_s14, 2048  }
 0x5ba   : > { %3019 = vsyncadd (%p2839_p12), %s2534_s14, 4294965248  ;;  %p17_p13 = scmp.ge.s32.totalorder %s3124_s27, 4   ;;  %s4922_s21 = smov %s3026_s22 }
 0x5bb   : > { %s4923_s22 = smov %s3030_s23  ;;  %s4924_s23 = smov %s3135_s30 }
 0x5bc   : > { %s4925_s24 = smov %s3124_s27  ;;  %19 = sbr.rel (!%p17_p13) target bundleno = 4 (0x4), region = 84 }
 0x5c1   :  { %2539 = vsyncpa [#allocation4], 1 }
 0x5c2   :  { %2541 = vsyncpa [#allocation4 + $0x1], 1 }
 0x5c3   :  { %2542 = vsyncpa [#allocation5], 1 }
 0x5c4   :  { %2544 = vsyncpa [#allocation5 + $0x1], 1 }

</bundles_post_ra>
